<compile_context>
chip_gen: v7x
topology: tpu7x:2x2x1
jax: 0.10.0
libtpu: 0.0.40
codegen_flags: <defaults>
</compile_context>

<pallas_src>
import functools

import jax
import jax.numpy as jnp
from jax import lax
from jax.experimental import pallas as pl
from jax.experimental.pallas import tpu as pltpu

_BN_EPS = 1e-5
_LANE = 128      # lane width      -> channel padding target
_SUBLANE = 8     # sublane width   -> padded-W multiple
_GUARD = 8       # aligned guard rows around the padded h1 scratch


def _round_up(x, m):
    return (x + m - 1) // m * m


def _pick_tile_h(H, Wp, Cp, max_tile_rows=2048):
    """Largest divisor of H whose flattened tile (TH*Wp rows x Cp lanes) keeps
    the handful of live f32 intermediates comfortably inside scoped VMEM on
    every TPU generation (incl. v7x's smaller VMEM)."""
    best = 1
    for th in range(1, H + 1):
        if H % th == 0 and th * Wp <= max_tile_rows:
            best = th
    return best


def _mish(x):
    """x * tanh(softplus(x)) via ONE exp + ONE approx reciprocal (EUP only).

    tanh(softplus(x)) = e*(e+2) / (e*(e+2)+2) with e = exp(x); exp is clamped
    so the ratio saturates to 1 instead of producing inf/inf.
    """
    e = jnp.exp(jnp.minimum(x, 20.0))
    t = e * (e + 2.0)
    return x * t * pl.reciprocal(t + 2.0, approx=True)


def _resblock_kernel(xc_ref, xt_ref, xb_ref, cm_ref, w1_ref, b1_ref, w3_ref,
                     b3_ref, o_ref, hp_ref, *, TH, Wp, Cp, mm_dtype):
    """One (image n, H-tile t) grid step.

    xc_ref : (1, TH, Wp, Cp)  centre rows of the W/C zero-padded input
    xt_ref : (1, 1,  Wp, Cp)  row above the tile (clamped; masked at first tile)
    xb_ref : (1, 1,  Wp, Cp)  row below the tile (clamped; masked at last tile)
    cm_ref : (1, Wp, Cp)      1.0 on real W columns, 0.0 on padded columns
    w1_ref : (Cp, Cp)         1x1 conv weight (BN folded), mm_dtype
    b1_ref : (1, Cp)          folded bias/shift, layer 1 (f32)
    w3_ref : (3, 3, Cp, Cp)   3x3 conv weight (BN folded), mm_dtype
    b3_ref : (1, Cp)          folded bias/shift, layer 2 (f32)
    o_ref  : (1, TH, Wp, Cp)  output tile (padded cols sliced off in wrapper)
    hp_ref : ((TH+2)*Wp + 2*_GUARD, Cp) f32 scratch: padded layer-1 activation
    """
    th = pl.program_id(1)
    n_th = pl.num_programs(1)

    w1 = w1_ref[...]
    b1 = b1_ref[...]
    col_mask = cm_ref[...]                                   # (1, Wp, Cp)

    def conv_bn_mish_1x1(x4, row_scale=None):
        r = x4.shape[1]
        xf = x4.reshape(r * Wp, Cp).astype(mm_dtype)
        h = jnp.dot(xf, w1, preferred_element_type=jnp.float32) + b1
        h = _mish(h).reshape(r, Wp, Cp) * col_mask           # zero W-pad cols
        if row_scale is not None:
            h = h * row_scale                                # zero boundary halo
        return h.reshape(r * Wp, Cp)

    # Guard rows only feed discarded (padded) output columns; zero them so the
    # scratch is deterministic / NaN-free.
    zg = jnp.zeros((_GUARD, Cp), jnp.float32)
    hp_ref[pl.ds(0, _GUARD), :] = zg
    hp_ref[pl.ds(_GUARD + (TH + 2) * Wp, _GUARD), :] = zg

    # ---- ConvBnAct #1 (1x1 conv == channel matmul), written straight into the
    # padded scratch.  Halo rows are recomputed here (cheap) and zeroed at the
    # image boundary, so the scratch holds exactly the zero-padded h1.
    top_scale = (th > 0).astype(jnp.float32)
    bot_scale = (th < n_th - 1).astype(jnp.float32)
    hp_ref[pl.ds(_GUARD, Wp), :] = conv_bn_mish_1x1(xt_ref[...], top_scale)
    hp_ref[pl.ds(_GUARD + Wp, TH * Wp), :] = conv_bn_mish_1x1(xc_ref[...])
    hp_ref[pl.ds(_GUARD + (TH + 1) * Wp, Wp), :] = conv_bn_mish_1x1(
        xb_ref[...], bot_scale)

    # ---- ConvBnAct #2 (3x3 "same" conv) as 9 row-shifted matmuls on the flat
    # scratch.  Shift = kh*Wp + (kw-1): the kw==1 taps are sublane-aligned
    # views; the off-by-one overruns only touch discarded padded columns.
    m = TH * Wp
    acc = None
    for kh in range(3):
        for kw in range(3):
            start = _GUARD + kh * Wp + (kw - 1)
            tap = hp_ref[pl.ds(start, m), :].astype(mm_dtype)
            part = jnp.dot(tap, w3_ref[kh, kw],
                           preferred_element_type=jnp.float32)
            acc = part if acc is None else acc + part
    h2 = _mish(acc + b3_ref[...])                            # (m, Cp) f32

    # ---- residual add + lane-dense, fully aligned store. --------------------
    res = xc_ref[...].reshape(m, Cp).astype(jnp.float32)
    o_ref[...] = (h2 + res).reshape(1, TH, Wp, Cp).astype(o_ref.dtype)


def res_block(x, params, *, matmul_dtype=jnp.bfloat16, tile_h=None,
              bn_eps=_BN_EPS):
    """ResBlock.forward for NCHW input (inference-mode BatchNorm)."""
    N, C, H, W = x.shape
    Cp = _round_up(max(C, _LANE), _LANE)        # lane-dense channels
    Wp = _round_up(W + 2, _SUBLANE)             # conv W padding + sublane align

    if tile_h is None:
        tile_h = _pick_tile_h(H, Wp, Cp)
    TH = tile_h
    if H % TH != 0:
        raise ValueError(f"tile_h={TH} must divide H={H}")
    n_th = H // TH

    f32 = jnp.float32
    # Fold eval-mode BN into the conv:  BN(conv(h,W)+b) = conv(h, a*W) + (a*b+c)
    # with a = gamma / sqrt(var + eps), c = beta - a * mean.
    a1 = params["gamma1"] / jnp.sqrt(params["var1"] + bn_eps)
    w1f = params["w1"][:, :, 0, 0].T * a1[None, :]                 # (Cin, Cout)
    b1f = a1 * params["b1"] + params["beta1"] - a1 * params["mean1"]
    a2 = params["gamma2"] / jnp.sqrt(params["var2"] + bn_eps)
    w3f = jnp.transpose(params["w3"], (2, 3, 1, 0)) * a2           # (3,3,Cin,Cout)
    b3f = a2 * params["b3"] + params["beta2"] - a2 * params["mean2"]

    # Zero-pad channels to Cp and width to Wp (1 zero column on the left, the
    # rest on the right).  Padded channels stay exactly zero end-to-end.
    w1p = jnp.zeros((Cp, Cp), f32).at[:C, :C].set(w1f).astype(matmul_dtype)
    w3p = jnp.zeros((3, 3, Cp, Cp), f32).at[:, :, :C, :C].set(w3f).astype(matmul_dtype)
    b1p = jnp.zeros((1, Cp), f32).at[0, :C].set(b1f.astype(f32))
    b3p = jnp.zeros((1, Cp), f32).at[0, :C].set(b3f.astype(f32))

    x_nhwc = jnp.transpose(x, (0, 2, 3, 1))     # layout adapter (PyTorch NCHW)
    x_pad = jnp.pad(x_nhwc, ((0, 0), (0, 0), (1, Wp - W - 1), (0, Cp - C)))

    wcol = jnp.arange(Wp)
    col_mask = jnp.broadcast_to(
        ((wcol >= 1) & (wcol <= W)).astype(f32)[None, :, None], (1, Wp, Cp))

    kernel = functools.partial(_resblock_kernel, TH=TH, Wp=Wp, Cp=Cp,
                               mm_dtype=matmul_dtype)

    out = pl.pallas_call(
        kernel,
        out_shape=jax.ShapeDtypeStruct((N, H, Wp, Cp), x.dtype),
        grid=(N, n_th),
        in_specs=[
            # centre tile
            pl.BlockSpec((1, TH, Wp, Cp), lambda n, t: (n, t, 0, 0)),
            # 1-row halos (clamped at the image boundary; masked in-kernel)
            pl.BlockSpec((1, 1, Wp, Cp),
                         lambda n, t: (n, jnp.maximum(t * TH - 1, 0), 0, 0)),
            pl.BlockSpec((1, 1, Wp, Cp),
                         lambda n, t: (n, jnp.minimum(t * TH + TH, H - 1), 0, 0)),
            # resident small operands (constant index_map -> stay in VMEM)
            pl.BlockSpec((1, Wp, Cp), lambda n, t: (0, 0, 0)),
            pl.BlockSpec((Cp, Cp), lambda n, t: (0, 0)),
            pl.BlockSpec((1, Cp), lambda n, t: (0, 0)),
            pl.BlockSpec((3, 3, Cp, Cp), lambda n, t: (0, 0, 0, 0)),
            pl.BlockSpec((1, Cp), lambda n, t: (0, 0)),
        ],
        out_specs=pl.BlockSpec((1, TH, Wp, Cp), lambda n, t: (n, t, 0, 0)),
        scratch_shapes=[
            pltpu.VMEM(((TH + 2) * Wp + 2 * _GUARD, Cp), jnp.float32)],
        compiler_params=pltpu.CompilerParams(
            dimension_semantics=("parallel", "parallel")),
    )(x_pad, x_pad, x_pad, col_mask, w1p, b1p, w3p, b3p)

    # Drop W / C zero padding, back to NCHW (PyTorch layout contract).
    return jnp.transpose(out[:, :, 1:W + 1, :C], (0, 3, 1, 2))


def _reference_resblock(x, params):
    """Pure-JAX/XLA reference: Conv2d + eval BatchNorm + Mish, twice, + x."""
    eps = _BN_EPS

    def conv_bn_act(h, w, b, gamma, beta, mean, var):
        pad = w.shape[-1] // 2
        z = lax.conv_general_dilated(
            h, w, window_strides=(1, 1),
            padding=((pad, pad), (pad, pad)),
            dimension_numbers=("NCHW", "OIHW", "NCHW"),
            precision=lax.Precision.HIGHEST)
        z = z + b[None, :, None, None]
        z = (gamma[None, :, None, None] * (z - mean[None, :, None, None])
             / jnp.sqrt(var + eps)[None, :, None, None]
             + beta[None, :, None, None])
        return z * jnp.tanh(jax.nn.softplus(z))     # Mish

    h = conv_bn_act(x, params["w1"], params["b1"], params["gamma1"],
                    params["beta1"], params["mean1"], params["var1"])
    h = conv_bn_act(h, params["w3"], params["b3"], params["gamma2"],
                    params["beta2"], params["mean2"], params["var2"])
    return h + x


if __name__ == "__main__":
    N, C, H, W = 2, 4, 16, 16
    keys = jax.random.split(jax.random.PRNGKey(0), 13)

    x = jax.random.normal(keys[0], (N, C, H, W), dtype=jnp.float32)
    params = dict(
        w1=jax.random.normal(keys[1], (C, C, 1, 1), jnp.float32) / jnp.sqrt(C),
        b1=0.1 * jax.random.normal(keys[2], (C,), jnp.float32),
        gamma1=1.0 + 0.1 * jax.random.normal(keys[3], (C,), jnp.float32),
        beta1=0.1 * jax.random.normal(keys[4], (C,), jnp.float32),
        mean1=0.1 * jax.random.normal(keys[5], (C,), jnp.float32),
        var1=0.5 + jax.random.uniform(keys[6], (C,), jnp.float32),
        w3=jax.random.normal(keys[7], (C, C, 3, 3), jnp.float32) / jnp.sqrt(9 * C),
        b3=0.1 * jax.random.normal(keys[8], (C,), jnp.float32),
        gamma2=1.0 + 0.1 * jax.random.normal(keys[9], (C,), jnp.float32),
        beta2=0.1 * jax.random.normal(keys[10], (C,), jnp.float32),
        mean2=0.1 * jax.random.normal(keys[11], (C,), jnp.float32),
        var2=0.5 + jax.random.uniform(keys[12], (C,), jnp.float32),
    )

    y_ref = _reference_resblock(x, params)

    # f32 matmul path, 4 H-tiles of 4 rows: exercises halo exchange + masks.
    y32 = jax.block_until_ready(
        res_block(x, params, matmul_dtype=jnp.float32, tile_h=4))
    assert y32.shape == (N, C, H, W), y32.shape
    if not jnp.allclose(y32, y_ref, atol=3e-2, rtol=3e-2):
        err = float(jnp.max(jnp.abs(y32 - y_ref)))
        raise AssertionError(f"f32 path mismatch (max abs err {err})")

    # bf16-operand / f32-accumulate path (recommended on v6e/v7x), 2 H-tiles.
    y16 = jax.block_until_ready(
        res_block(x, params, matmul_dtype=jnp.bfloat16, tile_h=8))
    assert y16.shape == (N, C, H, W), y16.shape
    if not jnp.allclose(y16, y_ref, atol=7e-2, rtol=7e-2):
        err = float(jnp.max(jnp.abs(y16 - y_ref)))
        raise AssertionError(f"bf16 path mismatch (max abs err {err})")

    print("KERNEL_OK")
</pallas_src>

<mosaic_0001>
module attributes {stable_mosaic.version = 11 : i64} {
  func.func @_resblock_kernel(%arg0: i32, %arg1: i32, %arg2: memref<1x4x24x128xf32, #tpu.memory_space<vmem>>, %arg3: memref<1x1x24x128xf32, #tpu.memory_space<vmem>>, %arg4: memref<1x1x24x128xf32, #tpu.memory_space<vmem>>, %arg5: memref<1x24x128xf32, #tpu.memory_space<vmem>>, %arg6: memref<128x128xf32, #tpu.memory_space<vmem>>, %arg7: memref<1x128xf32, #tpu.memory_space<vmem>>, %arg8: memref<3x3x128x128xf32, #tpu.memory_space<vmem>>, %arg9: memref<1x128xf32, #tpu.memory_space<vmem>>, %arg10: memref<1x4x24x128xf32, #tpu.memory_space<vmem>>, %arg11: memref<160x128xf32, #tpu.memory_space<vmem>>) attributes {dimension_semantics = [#tpu.dimension_semantics<parallel>, #tpu.dimension_semantics<parallel>], iteration_bounds = array<i64: 2, 4>, scalar_prefetch = 0 : i64, scratch_operands = 1 : i64, tpu.core_type = #tpu.core_type<tc>, window_params = [{transform_indices = @transform_0, window_bounds = array<i64: 1, 4, 24, 128>}, {transform_indices = @transform_1, window_bounds = array<i64: 1, 1, 24, 128>}, {transform_indices = @transform_2, window_bounds = array<i64: 1, 1, 24, 128>}, {pipeline_mode = #tpu.pipeline_mode<synchronous>, transform_indices = @transform_3, window_bounds = array<i64: 1, 24, 128>}, {pipeline_mode = #tpu.pipeline_mode<synchronous>, transform_indices = @transform_4, window_bounds = array<i64: 128, 128>}, {pipeline_mode = #tpu.pipeline_mode<synchronous>, transform_indices = @transform_5, window_bounds = array<i64: 1, 128>}, {pipeline_mode = #tpu.pipeline_mode<synchronous>, transform_indices = @transform_6, window_bounds = array<i64: 3, 3, 128, 128>}, {pipeline_mode = #tpu.pipeline_mode<synchronous>, transform_indices = @transform_7, window_bounds = array<i64: 1, 128>}, {transform_indices = @transform_8, window_bounds = array<i64: 1, 4, 24, 128>}]} {
    %c0 = arith.constant 0 : index
    %c0_0 = arith.constant 0 : index
    %0 = vector.load %arg6[%c0, %c0_0] : memref<128x128xf32, #tpu.memory_space<vmem>>, vector<128x128xf32>
    %c0_1 = arith.constant 0 : index
    %c0_2 = arith.constant 0 : index
    %1 = vector.load %arg7[%c0_1, %c0_2] : memref<1x128xf32, #tpu.memory_space<vmem>>, vector<1x128xf32>
    %c0_3 = arith.constant 0 : index
    %c0_4 = arith.constant 0 : index
    %c0_5 = arith.constant 0 : index
    %2 = vector.load %arg5[%c0_3, %c0_4, %c0_5] : memref<1x24x128xf32, #tpu.memory_space<vmem>>, vector<1x24x128xf32>
    %cst = arith.constant 0.000000e+00 : f32
    %3 = vector.broadcast %cst : f32 to vector<8x128xf32>
    %c0_6 = arith.constant 0 : index
    %c0_7 = arith.constant 0 : index
    %4 = vector.load %arg11[%c0_6, %c0_7] : memref<160x128xf32, #tpu.memory_space<vmem>>, vector<8x128xf32>
    tpu.vector_store %arg11[%c0_6, %c0_7], %3 {strides = array<i32>} : memref<160x128xf32, #tpu.memory_space<vmem>>, vector<8x128xf32>,
    %c152 = arith.constant 152 : index
    %c0_8 = arith.constant 0 : index
    %5 = vector.load %arg11[%c152, %c0_8] : memref<160x128xf32, #tpu.memory_space<vmem>>, vector<8x128xf32>
    tpu.vector_store %arg11[%c152, %c0_8], %3 {strides = array<i32>} : memref<160x128xf32, #tpu.memory_space<vmem>>, vector<8x128xf32>,
    %c0_i32 = arith.constant 0 : i32
    %6 = arith.cmpi sgt, %arg1, %c0_i32 : i32
    %7 = arith.extui %6 : i1 to i32
    %8 = arith.sitofp %7 : i32 to f32
    %c3_i32 = arith.constant 3 : i32
    %9 = arith.cmpi slt, %arg1, %c3_i32 : i32
    %10 = arith.extui %9 : i1 to i32
    %11 = arith.sitofp %10 : i32 to f32
    %c0_9 = arith.constant 0 : index
    %c0_10 = arith.constant 0 : index
    %c0_11 = arith.constant 0 : index
    %c0_12 = arith.constant 0 : index
    %12 = vector.load %arg3[%c0_9, %c0_10, %c0_11, %c0_12] : memref<1x1x24x128xf32, #tpu.memory_space<vmem>>, vector<1x1x24x128xf32>
    %13 = vector.shape_cast %12 : vector<1x1x24x128xf32> to vector<24x128xf32>
    %cst_13 = arith.constant dense<0.000000e+00> : vector<24x128xf32>
    %14 = tpu.matmul %13, %0, %cst_13 {dimension_numbers = #tpu.dot_dimension_numbers<[1], [0], [0], [1], [0, 0, 1, 1], [], []>} : vector<24x128xf32>, vector<128x128xf32>, vector<24x128xf32> -> vector<24x128xf32>
    %15 = vector.broadcast %1 : vector<1x128xf32> to vector<24x128xf32>
    %16 = arith.addf %14, %15 : vector<24x128xf32>
    %cst_14 = arith.constant 2.000000e+01 : f32
    %17 = vector.broadcast %cst_14 : f32 to vector<24x128xf32>
    %18 = arith.minimumf %16, %17 : vector<24x128xf32>
    %19 = math.exp %18 : vector<24x128xf32>
    %cst_15 = arith.constant 2.000000e+00 : f32
    %20 = vector.broadcast %cst_15 : f32 to vector<24x128xf32>
    %21 = arith.addf %19, %20 : vector<24x128xf32>
    %22 = arith.mulf %19, %21 : vector<24x128xf32>
    %23 = arith.mulf %16, %22 : vector<24x128xf32>
    %cst_16 = arith.constant 2.000000e+00 : f32
    %24 = vector.broadcast %cst_16 : f32 to vector<24x128xf32>
    %25 = arith.addf %22, %24 : vector<24x128xf32>
    %26 = tpu.reciprocal %25 {approx = true} : vector<24x128xf32> -> vector<24x128xf32>
    %27 = arith.mulf %23, %26 : vector<24x128xf32>
    %28 = vector.shape_cast %27 : vector<24x128xf32> to vector<1x24x128xf32>
    %29 = arith.mulf %28, %2 : vector<1x24x128xf32>
    %30 = vector.broadcast %8 : f32 to vector<1x24x128xf32>
    %31 = arith.mulf %29, %30 : vector<1x24x128xf32>
    %32 = vector.shape_cast %31 : vector<1x24x128xf32> to vector<24x128xf32>
    %c8 = arith.constant 8 : index
    %c0_17 = arith.constant 0 : index
    %33 = vector.load %arg11[%c8, %c0_17] : memref<160x128xf32, #tpu.memory_space<vmem>>, vector<24x128xf32>
    tpu.vector_store %arg11[%c8, %c0_17], %32 {strides = array<i32>} : memref<160x128xf32, #tpu.memory_space<vmem>>, vector<24x128xf32>,
    %c0_18 = arith.constant 0 : index
    %c0_19 = arith.constant 0 : index
    %c0_20 = arith.constant 0 : index
    %c0_21 = arith.constant 0 : index
    %34 = vector.load %arg2[%c0_18, %c0_19, %c0_20, %c0_21] : memref<1x4x24x128xf32, #tpu.memory_space<vmem>>, vector<1x4x24x128xf32>
    %35 = vector.shape_cast %34 : vector<1x4x24x128xf32> to vector<96x128xf32>
    %cst_22 = arith.constant dense<0.000000e+00> : vector<96x128xf32>
    %36 = tpu.matmul %35, %0, %cst_22 {dimension_numbers = #tpu.dot_dimension_numbers<[1], [0], [0], [1], [0, 0, 1, 1], [], []>} : vector<96x128xf32>, vector<128x128xf32>, vector<96x128xf32> -> vector<96x128xf32>
    %37 = vector.broadcast %1 : vector<1x128xf32> to vector<96x128xf32>
    %38 = arith.addf %36, %37 : vector<96x128xf32>
    %cst_23 = arith.constant 2.000000e+01 : f32
    %39 = vector.broadcast %cst_23 : f32 to vector<96x128xf32>
    %40 = arith.minimumf %38, %39 : vector<96x128xf32>
    %41 = math.exp %40 : vector<96x128xf32>
    %cst_24 = arith.constant 2.000000e+00 : f32
    %42 = vector.broadcast %cst_24 : f32 to vector<96x128xf32>
    %43 = arith.addf %41, %42 : vector<96x128xf32>
    %44 = arith.mulf %41, %43 : vector<96x128xf32>
    %45 = arith.mulf %38, %44 : vector<96x128xf32>
    %cst_25 = arith.constant 2.000000e+00 : f32
    %46 = vector.broadcast %cst_25 : f32 to vector<96x128xf32>
    %47 = arith.addf %44, %46 : vector<96x128xf32>
    %48 = tpu.reciprocal %47 {approx = true} : vector<96x128xf32> -> vector<96x128xf32>
    %49 = arith.mulf %45, %48 : vector<96x128xf32>
    %50 = vector.shape_cast %49 : vector<96x128xf32> to vector<4x24x128xf32>
    %51 = vector.broadcast %2 : vector<1x24x128xf32> to vector<4x24x128xf32>
    %52 = arith.mulf %50, %51 : vector<4x24x128xf32>
    %53 = vector.shape_cast %52 : vector<4x24x128xf32> to vector<96x128xf32>
    %c32 = arith.constant 32 : index
    %c0_26 = arith.constant 0 : index
    %54 = vector.load %arg11[%c32, %c0_26] : memref<160x128xf32, #tpu.memory_space<vmem>>, vector<96x128xf32>
    tpu.vector_store %arg11[%c32, %c0_26], %53 {strides = array<i32>} : memref<160x128xf32, #tpu.memory_space<vmem>>, vector<96x128xf32>,
    %c0_27 = arith.constant 0 : index
    %c0_28 = arith.constant 0 : index
    %c0_29 = arith.constant 0 : index
    %c0_30 = arith.constant 0 : index
    %55 = vector.load %arg4[%c0_27, %c0_28, %c0_29, %c0_30] : memref<1x1x24x128xf32, #tpu.memory_space<vmem>>, vector<1x1x24x128xf32>
    %56 = vector.shape_cast %55 : vector<1x1x24x128xf32> to vector<24x128xf32>
    %cst_31 = arith.constant dense<0.000000e+00> : vector<24x128xf32>
    %57 = tpu.matmul %56, %0, %cst_31 {dimension_numbers = #tpu.dot_dimension_numbers<[1], [0], [0], [1], [0, 0, 1, 1], [], []>} : vector<24x128xf32>, vector<128x128xf32>, vector<24x128xf32> -> vector<24x128xf32>
    %58 = vector.broadcast %1 : vector<1x128xf32> to vector<24x128xf32>
    %59 = arith.addf %57, %58 : vector<24x128xf32>
    %cst_32 = arith.constant 2.000000e+01 : f32
    %60 = vector.broadcast %cst_32 : f32 to vector<24x128xf32>
    %61 = arith.minimumf %59, %60 : vector<24x128xf32>
    %62 = math.exp %61 : vector<24x128xf32>
    %cst_33 = arith.constant 2.000000e+00 : f32
    %63 = vector.broadcast %cst_33 : f32 to vector<24x128xf32>
    %64 = arith.addf %62, %63 : vector<24x128xf32>
    %65 = arith.mulf %62, %64 : vector<24x128xf32>
    %66 = arith.mulf %59, %65 : vector<24x128xf32>
    %cst_34 = arith.constant 2.000000e+00 : f32
    %67 = vector.broadcast %cst_34 : f32 to vector<24x128xf32>
    %68 = arith.addf %65, %67 : vector<24x128xf32>
    %69 = tpu.reciprocal %68 {approx = true} : vector<24x128xf32> -> vector<24x128xf32>
    %70 = arith.mulf %66, %69 : vector<24x128xf32>
    %71 = vector.shape_cast %70 : vector<24x128xf32> to vector<1x24x128xf32>
    %72 = arith.mulf %71, %2 : vector<1x24x128xf32>
    %73 = vector.broadcast %11 : f32 to vector<1x24x128xf32>
    %74 = arith.mulf %72, %73 : vector<1x24x128xf32>
    %75 = vector.shape_cast %74 : vector<1x24x128xf32> to vector<24x128xf32>
    %c128 = arith.constant 128 : index
    %c0_35 = arith.constant 0 : index
    %76 = vector.load %arg11[%c128, %c0_35] : memref<160x128xf32, #tpu.memory_space<vmem>>, vector<24x128xf32>
    tpu.vector_store %arg11[%c128, %c0_35], %75 {strides = array<i32>} : memref<160x128xf32, #tpu.memory_space<vmem>>, vector<24x128xf32>,
    %c7 = arith.constant 7 : index
    %c0_36 = arith.constant 0 : index
    %77 = vector.load %arg11[%c7, %c0_36] : memref<160x128xf32, #tpu.memory_space<vmem>>, vector<96x128xf32>
    %c0_37 = arith.constant 0 : index
    %c0_38 = arith.constant 0 : index
    %c0_39 = arith.constant 0 : index
    %c0_40 = arith.constant 0 : index
    %78 = vector.load %arg8[%c0_37, %c0_38, %c0_39, %c0_40] : memref<3x3x128x128xf32, #tpu.memory_space<vmem>>, vector<1x1x128x128xf32>
    %79 = vector.shape_cast %78 : vector<1x1x128x128xf32> to vector<128x128xf32>
    %cst_41 = arith.constant dense<0.000000e+00> : vector<96x128xf32>
    %80 = tpu.matmul %77, %79, %cst_41 {dimension_numbers = #tpu.dot_dimension_numbers<[1], [0], [0], [1], [0, 0, 1, 1], [], []>} : vector<96x128xf32>, vector<128x128xf32>, vector<96x128xf32> -> vector<96x128xf32>
    %c8_42 = arith.constant 8 : index
    %c0_43 = arith.constant 0 : index
    %81 = vector.load %arg11[%c8_42, %c0_43] : memref<160x128xf32, #tpu.memory_space<vmem>>, vector<96x128xf32>
    %c0_44 = arith.constant 0 : index
    %c1 = arith.constant 1 : index
    %c0_45 = arith.constant 0 : index
    %c0_46 = arith.constant 0 : index
    %82 = vector.load %arg8[%c0_44, %c1, %c0_45, %c0_46] : memref<3x3x128x128xf32, #tpu.memory_space<vmem>>, vector<1x1x128x128xf32>
    %83 = vector.shape_cast %82 : vector<1x1x128x128xf32> to vector<128x128xf32>
    %cst_47 = arith.constant dense<0.000000e+00> : vector<96x128xf32>
    %84 = tpu.matmul %81, %83, %cst_47 {dimension_numbers = #tpu.dot_dimension_numbers<[1], [0], [0], [1], [0, 0, 1, 1], [], []>} : vector<96x128xf32>, vector<128x128xf32>, vector<96x128xf32> -> vector<96x128xf32>
    %85 = arith.addf %80, %84 : vector<96x128xf32>
    %c9 = arith.constant 9 : index
    %c0_48 = arith.constant 0 : index
    %86 = vector.load %arg11[%c9, %c0_48] : memref<160x128xf32, #tpu.memory_space<vmem>>, vector<96x128xf32>
    %c0_49 = arith.constant 0 : index
    %c2 = arith.constant 2 : index
    %c0_50 = arith.constant 0 : index
    %c0_51 = arith.constant 0 : index
    %87 = vector.load %arg8[%c0_49, %c2, %c0_50, %c0_51] : memref<3x3x128x128xf32, #tpu.memory_space<vmem>>, vector<1x1x128x128xf32>
    %88 = vector.shape_cast %87 : vector<1x1x128x128xf32> to vector<128x128xf32>
    %cst_52 = arith.constant dense<0.000000e+00> : vector<96x128xf32>
    %89 = tpu.matmul %86, %88, %cst_52 {dimension_numbers = #tpu.dot_dimension_numbers<[1], [0], [0], [1], [0, 0, 1, 1], [], []>} : vector<96x128xf32>, vector<128x128xf32>, vector<96x128xf32> -> vector<96x128xf32>
    %90 = arith.addf %85, %89 : vector<96x128xf32>
    %c31 = arith.constant 31 : index
    %c0_53 = arith.constant 0 : index
    %91 = vector.load %arg11[%c31, %c0_53] : memref<160x128xf32, #tpu.memory_space<vmem>>, vector<96x128xf32>
    %c1_54 = arith.constant 1 : index
    %c0_55 = arith.constant 0 : index
    %c0_56 = arith.constant 0 : index
    %c0_57 = arith.constant 0 : index
    %92 = vector.load %arg8[%c1_54, %c0_55, %c0_56, %c0_57] : memref<3x3x128x128xf32, #tpu.memory_space<vmem>>, vector<1x1x128x128xf32>
    %93 = vector.shape_cast %92 : vector<1x1x128x128xf32> to vector<128x128xf32>
    %cst_58 = arith.constant dense<0.000000e+00> : vector<96x128xf32>
    %94 = tpu.matmul %91, %93, %cst_58 {dimension_numbers = #tpu.dot_dimension_numbers<[1], [0], [0], [1], [0, 0, 1, 1], [], []>} : vector<96x128xf32>, vector<128x128xf32>, vector<96x128xf32> -> vector<96x128xf32>
    %95 = arith.addf %90, %94 : vector<96x128xf32>
    %c32_59 = arith.constant 32 : index
    %c0_60 = arith.constant 0 : index
    %96 = vector.load %arg11[%c32_59, %c0_60] : memref<160x128xf32, #tpu.memory_space<vmem>>, vector<96x128xf32>
    %c1_61 = arith.constant 1 : index
    %c1_62 = arith.constant 1 : index
    %c0_63 = arith.constant 0 : index
    %c0_64 = arith.constant 0 : index
    %97 = vector.load %arg8[%c1_61, %c1_62, %c0_63, %c0_64] : memref<3x3x128x128xf32, #tpu.memory_space<vmem>>, vector<1x1x128x128xf32>
    %98 = vector.shape_cast %97 : vector<1x1x128x128xf32> to vector<128x128xf32>
    %cst_65 = arith.constant dense<0.000000e+00> : vector<96x128xf32>
    %99 = tpu.matmul %96, %98, %cst_65 {dimension_numbers = #tpu.dot_dimension_numbers<[1], [0], [0], [1], [0, 0, 1, 1], [], []>} : vector<96x128xf32>, vector<128x128xf32>, vector<96x128xf32> -> vector<96x128xf32>
    %100 = arith.addf %95, %99 : vector<96x128xf32>
    %c33 = arith.constant 33 : index
    %c0_66 = arith.constant 0 : index
    %101 = vector.load %arg11[%c33, %c0_66] : memref<160x128xf32, #tpu.memory_space<vmem>>, vector<96x128xf32>
    %c1_67 = arith.constant 1 : index
    %c2_68 = arith.constant 2 : index
    %c0_69 = arith.constant 0 : index
    %c0_70 = arith.constant 0 : index
    %102 = vector.load %arg8[%c1_67, %c2_68, %c0_69, %c0_70] : memref<3x3x128x128xf32, #tpu.memory_space<vmem>>, vector<1x1x128x128xf32>
    %103 = vector.shape_cast %102 : vector<1x1x128x128xf32> to vector<128x128xf32>
    %cst_71 = arith.constant dense<0.000000e+00> : vector<96x128xf32>
    %104 = tpu.matmul %101, %103, %cst_71 {dimension_numbers = #tpu.dot_dimension_numbers<[1], [0], [0], [1], [0, 0, 1, 1], [], []>} : vector<96x128xf32>, vector<128x128xf32>, vector<96x128xf32> -> vector<96x128xf32>
    %105 = arith.addf %100, %104 : vector<96x128xf32>
    %c55 = arith.constant 55 : index
    %c0_72 = arith.constant 0 : index
    %106 = vector.load %arg11[%c55, %c0_72] : memref<160x128xf32, #tpu.memory_space<vmem>>, vector<96x128xf32>
    %c2_73 = arith.constant 2 : index
    %c0_74 = arith.constant 0 : index
    %c0_75 = arith.constant 0 : index
    %c0_76 = arith.constant 0 : index
    %107 = vector.load %arg8[%c2_73, %c0_74, %c0_75, %c0_76] : memref<3x3x128x128xf32, #tpu.memory_space<vmem>>, vector<1x1x128x128xf32>
    %108 = vector.shape_cast %107 : vector<1x1x128x128xf32> to vector<128x128xf32>
    %cst_77 = arith.constant dense<0.000000e+00> : vector<96x128xf32>
    %109 = tpu.matmul %106, %108, %cst_77 {dimension_numbers = #tpu.dot_dimension_numbers<[1], [0], [0], [1], [0, 0, 1, 1], [], []>} : vector<96x128xf32>, vector<128x128xf32>, vector<96x128xf32> -> vector<96x128xf32>
    %110 = arith.addf %105, %109 : vector<96x128xf32>
    %c56 = arith.constant 56 : index
    %c0_78 = arith.constant 0 : index
    %111 = vector.load %arg11[%c56, %c0_78] : memref<160x128xf32, #tpu.memory_space<vmem>>, vector<96x128xf32>
    %c2_79 = arith.constant 2 : index
    %c1_80 = arith.constant 1 : index
    %c0_81 = arith.constant 0 : index
    %c0_82 = arith.constant 0 : index
    %112 = vector.load %arg8[%c2_79, %c1_80, %c0_81, %c0_82] : memref<3x3x128x128xf32, #tpu.memory_space<vmem>>, vector<1x1x128x128xf32>
    %113 = vector.shape_cast %112 : vector<1x1x128x128xf32> to vector<128x128xf32>
    %cst_83 = arith.constant dense<0.000000e+00> : vector<96x128xf32>
    %114 = tpu.matmul %111, %113, %cst_83 {dimension_numbers = #tpu.dot_dimension_numbers<[1], [0], [0], [1], [0, 0, 1, 1], [], []>} : vector<96x128xf32>, vector<128x128xf32>, vector<96x128xf32> -> vector<96x128xf32>
    %115 = arith.addf %110, %114 : vector<96x128xf32>
    %c57 = arith.constant 57 : index
    %c0_84 = arith.constant 0 : index
    %116 = vector.load %arg11[%c57, %c0_84] : memref<160x128xf32, #tpu.memory_space<vmem>>, vector<96x128xf32>
    %c2_85 = arith.constant 2 : index
    %c2_86 = arith.constant 2 : index
    %c0_87 = arith.constant 0 : index
    %c0_88 = arith.constant 0 : index
    %117 = vector.load %arg8[%c2_85, %c2_86, %c0_87, %c0_88] : memref<3x3x128x128xf32, #tpu.memory_space<vmem>>, vector<1x1x128x128xf32>
    %118 = vector.shape_cast %117 : vector<1x1x128x128xf32> to vector<128x128xf32>
    %cst_89 = arith.constant dense<0.000000e+00> : vector<96x128xf32>
    %119 = tpu.matmul %116, %118, %cst_89 {dimension_numbers = #tpu.dot_dimension_numbers<[1], [0], [0], [1], [0, 0, 1, 1], [], []>} : vector<96x128xf32>, vector<128x128xf32>, vector<96x128xf32> -> vector<96x128xf32>
    %120 = arith.addf %115, %119 : vector<96x128xf32>
    %c0_90 = arith.constant 0 : index
    %c0_91 = arith.constant 0 : index
    %121 = vector.load %arg9[%c0_90, %c0_91] : memref<1x128xf32, #tpu.memory_space<vmem>>, vector<1x128xf32>
    %122 = vector.broadcast %121 : vector<1x128xf32> to vector<96x128xf32>
    %123 = arith.addf %120, %122 : vector<96x128xf32>
    %cst_92 = arith.constant 2.000000e+01 : f32
    %124 = vector.broadcast %cst_92 : f32 to vector<96x128xf32>
    %125 = arith.minimumf %123, %124 : vector<96x128xf32>
    %126 = math.exp %125 : vector<96x128xf32>
    %cst_93 = arith.constant 2.000000e+00 : f32
    %127 = vector.broadcast %cst_93 : f32 to vector<96x128xf32>
    %128 = arith.addf %126, %127 : vector<96x128xf32>
    %129 = arith.mulf %126, %128 : vector<96x128xf32>
    %130 = arith.mulf %123, %129 : vector<96x128xf32>
    %cst_94 = arith.constant 2.000000e+00 : f32
    %131 = vector.broadcast %cst_94 : f32 to vector<96x128xf32>
    %132 = arith.addf %129, %131 : vector<96x128xf32>
    %133 = tpu.reciprocal %132 {approx = true} : vector<96x128xf32> -> vector<96x128xf32>
    %134 = arith.mulf %130, %133 : vector<96x128xf32>
    %c0_95 = arith.constant 0 : index
    %c0_96 = arith.constant 0 : index
    %c0_97 = arith.constant 0 : index
    %c0_98 = arith.constant 0 : index
    %135 = vector.load %arg2[%c0_95, %c0_96, %c0_97, %c0_98] : memref<1x4x24x128xf32, #tpu.memory_space<vmem>>, vector<1x4x24x128xf32>
    %136 = vector.shape_cast %135 : vector<1x4x24x128xf32> to vector<96x128xf32>
    %137 = arith.addf %134, %136 : vector<96x128xf32>
    %138 = vector.shape_cast %137 : vector<96x128xf32> to vector<1x4x24x128xf32>
    %c0_99 = arith.constant 0 : index
    %c0_100 = arith.constant 0 : index
    %c0_101 = arith.constant 0 : index
    %c0_102 = arith.constant 0 : index
    %139 = vector.load %arg10[%c0_99, %c0_100, %c0_101, %c0_102] : memref<1x4x24x128xf32, #tpu.memory_space<vmem>>, vector<1x4x24x128xf32>
    tpu.vector_store %arg10[%c0_99, %c0_100, %c0_101, %c0_102], %138 {strides = array<i32>} : memref<1x4x24x128xf32, #tpu.memory_space<vmem>>, vector<1x4x24x128xf32>,
    return
  }
  func.func @transform_0(%arg0: i32, %arg1: i32) -> (i32, i32, i32, i32) {
    %c0_i32 = arith.constant 0 : i32
    %c0_i32_0 = arith.constant 0 : i32
    %c0_i32_1 = arith.constant 0 : i32
    return %arg0, %arg1, %c0_i32, %c0_i32_0 : i32, i32, i32, i32
  }
  func.func @transform_1(%arg0: i32, %arg1: i32) -> (i32, i32, i32, i32) {
    %c4_i32 = arith.constant 4 : i32
    %0 = arith.muli %arg1, %c4_i32 : i32
    %c1_i32 = arith.constant 1 : i32
    %1 = arith.subi %0, %c1_i32 : i32
    %c0_i32 = arith.constant 0 : i32
    %2 = arith.maxsi %1, %c0_i32 : i32
    %c0_i32_0 = arith.constant 0 : i32
    %c0_i32_1 = arith.constant 0 : i32
    %c0_i32_2 = arith.constant 0 : i32
    return %arg0, %2, %c0_i32_0, %c0_i32_1 : i32, i32, i32, i32
  }
  func.func @transform_2(%arg0: i32, %arg1: i32) -> (i32, i32, i32, i32) {
    %c4_i32 = arith.constant 4 : i32
    %0 = arith.muli %arg1, %c4_i32 : i32
    %c4_i32_0 = arith.constant 4 : i32
    %1 = arith.addi %0, %c4_i32_0 : i32
    %c15_i32 = arith.constant 15 : i32
    %2 = arith.minsi %1, %c15_i32 : i32
    %c0_i32 = arith.constant 0 : i32
    %c0_i32_1 = arith.constant 0 : i32
    %c0_i32_2 = arith.constant 0 : i32
    return %arg0, %2, %c0_i32, %c0_i32_1 : i32, i32, i32, i32
  }
  func.func @transform_3(%arg0: i32, %arg1: i32) -> (i32, i32, i32) {
    %c0_i32 = arith.constant 0 : i32
    %c0_i32_0 = arith.constant 0 : i32
    %c0_i32_1 = arith.constant 0 : i32
    %c0_i32_2 = arith.constant 0 : i32
    return %c0_i32, %c0_i32_0, %c0_i32_1 : i32, i32, i32
  }
  func.func @transform_4(%arg0: i32, %arg1: i32) -> (i32, i32) {
    %c0_i32 = arith.constant 0 : i32
    %c0_i32_0 = arith.constant 0 : i32
    %c0_i32_1 = arith.constant 0 : i32
    return %c0_i32, %c0_i32_0 : i32, i32
  }
  func.func @transform_5(%arg0: i32, %arg1: i32) -> (i32, i32) {
    %c0_i32 = arith.constant 0 : i32
    %c0_i32_0 = arith.constant 0 : i32
    %c0_i32_1 = arith.constant 0 : i32
    return %c0_i32, %c0_i32_0 : i32, i32
  }
  func.func @transform_6(%arg0: i32, %arg1: i32) -> (i32, i32, i32, i32) {
    %c0_i32 = arith.constant 0 : i32
    %c0_i32_0 = arith.constant 0 : i32
    %c0_i32_1 = arith.constant 0 : i32
    %c0_i32_2 = arith.constant 0 : i32
    %c0_i32_3 = arith.constant 0 : i32
    return %c0_i32, %c0_i32_0, %c0_i32_1, %c0_i32_2 : i32, i32, i32, i32
  }
  func.func @transform_7(%arg0: i32, %arg1: i32) -> (i32, i32) {
    %c0_i32 = arith.constant 0 : i32
    %c0_i32_0 = arith.constant 0 : i32
    %c0_i32_1 = arith.constant 0 : i32
    return %c0_i32, %c0_i32_0 : i32, i32
  }
  func.func @transform_8(%arg0: i32, %arg1: i32) -> (i32, i32, i32, i32) {
    %c0_i32 = arith.constant 0 : i32
    %c0_i32_0 = arith.constant 0 : i32
    %c0_i32_1 = arith.constant 0 : i32
    return %arg0, %arg1, %c0_i32, %c0_i32_0 : i32, i32, i32, i32
  }
}

</mosaic_0001>

<bundles_post_ra>
// kernel: tpu_custom_call.1
= control target key start
LH: loop header
LB: loop body
LE: loop exit
PB: predicated region body
PF: predicated region fallthrough
CT: control target
= control target key end

     0   :  { %s6022_s0 = inlined_call_operand.hbm [shape: f32[2,16,24,128], index: 0, kind: input, shape index: {}]   ;;  %s6023_s1 = inlined_call_operand.hbm [shape: f32[2,16,24,128], index: 1, kind: input, shape index: {}]   ;;  %s6024_s2 = inlined_call_operand.hbm [shape: f32[2,16,24,128], index: 2, kind: input, shape index: {}]   ;;  %s6025_s3 = inlined_call_operand.hbm [shape: f32[1,24,128], index: 3, kind: input, shape index: {}]   ;;  %s6026_s4 = inlined_call_operand.hbm [shape: f32[128,128], index: 4, kind: input, shape index: {}]   ;;  %s6027_s5 = inlined_call_operand.vmem [shape: f32[1,128], index: 5, kind: input, shape index: {}]   ;;  %s6028_s6 = inlined_call_operand.hbm [shape: f32[3,3,128,128], index: 6, kind: input, shape index: {}]   ;;  %s6029_s7 = inlined_call_operand.vmem [shape: f32[1,128], index: 7, kind: input, shape index: {}]   ;;  %s6030_s8 = inlined_call_operand.hbm [shape: f32[2,16,24,128], index: 8, kind: output, shape index: {}]  }
   0x1   :  { %6059 = sst [smem:[#allocation35_spill]] %s6022_s0 }
   0x2   :  { %6060 = sst [smem:[#allocation36_spill]] %s6023_s1 }
   0x3   :  { %6061 = sst [smem:[#allocation37_spill]] %s6024_s2 }
   0x4   :  { %6062 = sst [smem:[#allocation38_spill]] %s6025_s3 }
   0x5   :  { %6063 = sst [smem:[#allocation39_spill]] %s6026_s4 }
   0x6   :  { %6064 = sst [smem:[#allocation40_spill]] %s6027_s5 }
   0x7   :  { %6065 = sst [smem:[#allocation41_spill]] %s6028_s6 }
   0x8   :  { %6066 = sst [smem:[#allocation42_spill]] %s6029_s7 }
   0x9   :  { %6067 = sst [smem:[#allocation43_spill]] %s6030_s8 }
   0xa   :  { %13 = vsyncpa [#allocation4], 0 }
   0xb   :  { %15 = vsyncpa [#allocation4 + $0x1], 0 }
   0xc   :  { %16 = vsyncpa [#allocation7], 0 }
   0xd   :  { %18 = vsyncpa [#allocation7 + $0x1], 0 }
   0xe   :  { %19 = vsyncpa [#allocation10], 0 }
   0xf   :  { %20 = vsyncpa [#allocation13], 0 }
  0x10   :  { %21 = vsyncpa [#allocation5], 0 }
  0x11   :  { %23 = vsyncpa [#allocation5 + $0x1], 0  ;;  %s4967_s27 = smov 0   ;;  %s4969_s28 = smov 0  }
  0x12   :  { %s4971_s29 = smov 0   ;;  %s4973_s30 = smov 0  }
  0x13   :  { %s4975_s9 = smov 0   ;;  %s4977_s10 = smov 0  }
  0x14   :  { %s4979_s11 = smov 0   ;;  %s4981_s12 = smov 0  }
  0x15   :  { %s4983_s13 = smov 0   ;;  %s4985_s14 = smov 0  }
  0x16   :  { %s4987_s15 = smov 0   ;;  %s4989_s16 = smov 0  }
  0x17   :  { %s4991_s17 = smov 0   ;;  %s4993_s18 = smov 0  }
  0x18 LB: > { %6068 = sst [smem:[#allocation21_spill]] %s4854_s27  ;;  %s5038_s19 = sadd.s32 4294967295, %s4906_s18   ;;  %s4906_s18 = sphi %s4993_s18, %s29_s18   ;;  %s4902_s17 = sphi %s4991_s17, %s6143_s17   ;;  %s4898_s16 = sphi %s4989_s16, %s6150_s16   ;;  %s4894_s15 = sphi %s4987_s15, %s6141_s15   ;;  %s4890_s14 = sphi %s4985_s14, %s6149_s14   ;;  %s4886_s13 = sphi %s4983_s13, %s6148_s13   ;;  %s4882_s12 = sphi %s4981_s12, %s6147_s12   ;;  %s4878_s11 = sphi %s4979_s11, %s6146_s11   ;;  %s4874_s10 = sphi %s4977_s10, %s6140_s10   ;;  %s4870_s9 = sphi %s4975_s9, %s6139_s9   ;;  %s4866_s30 = sphi %s4973_s30, %s6138_s30   ;;  %s4862_s29 = sphi %s4971_s29, %s6145_s29   ;;  %s4858_s28 = sphi %s4969_s28, %s6144_s28   ;;  %s4854_s27 = sphi %s4967_s27, %s6137_s27  }
  0x19   : > { %6069 = sst [smem:[#allocation22_spill]] %s4858_s28  ;;  %p2874_p0 = scmp.ge.s32.totalorder %s4906_s18, 1 }
  0x1a   : > { %6070 = sst [smem:[#allocation23_spill]] %s4870_s9  ;;  %p6033_p1 = scmp.eq.s32.totalorder %s5038_s19, 0 }
  0x1b   : > { %6071 = sst [smem:[#allocation24_spill]] %s4874_s10  ;;  %p279_p3 = scmp.lt.s32.totalorder %s4906_s18, 9 }
  0x1c   : > { %6072 = sst [smem:[#allocation25_spill]] %s4890_s14  ;;  %s4908_s21 = smov [#allocation9]  }
  0x1d   : > { %6073 = sst [smem:[#allocation26_spill]] %s4894_s15  ;;  %p5044_p4 = pnand %p2874_p0, %p279_p3 }
  0x1e   : > { %6074 = sst [smem:[#allocation27_spill]] %s4902_s17  ;;  %s291_s22 = sshll.u32 %s4908_s21, 4  ;;  %s292_s22 = int_to_ptr.vmem [resolvable:$true] %s291_s22 }
  0x1f   : > { %s6075_s20 = scalar_select %p5044_p4, 1, 0 }
  0x20   : > { %p4296_p5 = pneg %p5044_p4  ;;  %s6078_s3 = sld [smem:[#allocation38_spill]] }
  0x21   : > { %6076 = sst [smem:[#allocation28_spill]] %s6075_s20 }
  0x22   : > { %p5052_p6 = pnand %p4296_p5, %p6033_p1 }
  0x24   : > { %s6077_s23 = scalar_select %p5052_p6, 1, 0 }
  0x25   : > { %p5064_p8 = pneg %p5052_p6 }
  0x26   : > { %s4570_s26 = scalar_lea.hbm %s6078_s3, 384 }
  0x27   : > { %p4571_p7 = scmp.ne.s32.totalorder %s6078_s3, %s4570_s26  ;;  %p4577_p11 = scmp.lt.u32.totalorder %s4570_s26, %s6078_s3 }
  0x29   : > { %p4573_p9 = pnand %p5064_p8, %p4571_p7 }
  0x2b   : > { %p4574_p10 = pneg %p4573_p9 }
  0x2d   : > { %p4579_p12 = pnand %p4577_p11, %p4574_p10 }
  0x2f   : > { %4582 = shalt.err (!%p4579_p12)
}
  0x30   : > { %s4583_s24 = scalar_lea.vmem %s292_s22, 384  ;;  %p4591_p5 = scmp.lt.s32.totalorder %s292_s22, %s292_s22 }
  0x31   : > { %p4584_p13 = scmp.ne.s32.totalorder %s292_s22, %s4583_s24  ;;  %p4592_p2 = scmp.lt.s32.totalorder %s4583_s24, %s4583_s24 }
  0x33   : > { %p4586_p0 = pnand %p4584_p13, %p5064_p8  ;;  %p4593_p1 = por %p4592_p2, %p4591_p5 }
  0x35   : > { %p4587_p3 = pneg %p4586_p0 }
  0x37   : > { %p4594_p4 = pnand %p4593_p1, %p4587_p3 }
  0x39   : > { %4597 = shalt.err (!%p4594_p4)
}
  0x3a   : > { %s6037_s8 = smov 128   ;;  %s6039_s7 = smov 8  }
  0x3b   : > { %4299 = dma.hbm_to_vmem [thread:$0]  (!%p5052_p6), %s6078_s3, 384, %s292_s22, [#allocation10], %s6037_s8, %s6037_s8, %s6039_s7  }
  0x3c   : > { %s38_s25 = sadd.s32 1, %s4898_s16  ;;  %s41_s26 = sadd.s32 1, %s4902_s17 }
  0x3d   : > { %p39_p1 = scmp.ge.s32.totalorder %s38_s25, 4  ;;  %p6053_p2 = scmp.eq.s32.totalorder %s4906_s18, 0 }
  0x3e   : > { %s2868_s24 = sshll.u32 %s4898_s16, 2  ;;  %s86_s5 = sadd.s32 1, %s4874_s10 }
  0x3f   : > { %s6152_s25 = smov (%p39_p1, %s38_s25), 0  ;;  %s6154_s26 = smov (!%p39_p1, %s41_s26), %s4902_s17 }
  0x40   : > { %6080 = sst [smem:[#allocation29_spill]] %s6152_s25  ;;  %s46_s20 = ssub.s32 %s4898_s16, %s6152_s25 }
  0x41   : > { %s2869_s2 = sadd.s32 4294967295, %s2868_s24  ;;  %p43_p4 = scmp.ge.s32.totalorder %s6154_s26, 2 }
  0x42   : > { %p75_p7 = scmp.gt.s32.totalorder %s2869_s2, 0  ;;  %s2870_s22 = sshll.u32 %s6152_s25, 2 }
  0x43   : > { %p93_p9 = scmp.ne.s32.totalorder %s4874_s10, %s4870_s9  ;;  %s6156_s26 = smov (%p43_p4, %s6154_s26), 0 }
  0x44   : > { %6081 = sst [smem:[#allocation30_spill]] %s6156_s26  ;;  %s6158_s2 = smov (!%p75_p7, %s2869_s2), 0 }
  0x45   : > { %s5100_s14 = ssub.s32 %s4902_s17, %s6156_s26  ;;  %s2871_s15 = sadd.s32 4294967295, %s2870_s22 }
  0x46   : > { %6082 = sst [smem:[#allocation31_spill]] %s5100_s14  ;;  %s5103_s8 = sor.u32 %s46_s20, %s5100_s14 }
  0x47   : > { %p79_p10 = scmp.gt.s32.totalorder %s2871_s15, 0  ;;  %p5108_p12 = por %p93_p9, %p6053_p2 }
  0x48   : > { %p99_p13 = scmp.ne.s32.totalorder %s4870_s9, %s4866_s30  ;;  %s5114_s3 = sadd.s32 4, %s2868_s24 }
  0x49   : > { %s6160_s15 = smov (!%p79_p10, %s2871_s15), 0  ;;  %p6084_p3 = scmp.eq.s32.totalorder %s5038_s19, 0 }
  0x4a   : > { %s82_s20 = ssub.s32 %s6158_s2, %s6160_s15  ;;  %s5124_s27 = sadd.s32 4, %s2870_s22 }
  0x4b   : > { %s83_s26 = sor.u32 %s82_s20, %s5100_s14  ;;  %p5120_p5 = por %p99_p13, %p6084_p3 }
  0x4c   : > { %p84_p1 = scmp.eq.s32.totalorder %s83_s26, 0  ;;  %6087 = sst [smem:[#allocation33_spill]] %s5124_s27 }
  0x4d   : > { %s6085_s25 = scalar_select %p5120_p5, 1, 0 }
  0x4e   : > { %p6052_p7 = scmp.lt.s32.totalorder %s4906_s18, 8  ;;  %s5132_s30 = smul.u32 48, %s4902_s17 }
  0x4f   : > { %6086 = sst [smem:[#allocation32_spill]] %s6085_s25  ;;  %s361_s24 = sand.u32 1, %s4906_s18  }
  0x50   : > { %s5129_s28 = scalar_select %p84_p1, %s4874_s10, %s86_s5  }
  0x51   : > { %s363_s15 = sand.u32 1, %s4874_s10   ;;  %p5140_p9 = pnand %p6052_p7, %p5108_p12 }
  0x52   : > { %6088 = sst [smem:[#allocation34_spill]] %s5129_s28  ;;  %s4265_s9 = smul.u32 24, %s363_s15 }
  0x53   : > { %s4266_s26 = smul.u32 3, %s6158_s2  ;;  %s6090_s1 = sld [smem:[#allocation36_spill]] }
  0x54   : > { %s365_s25 = scalar_lea.vmem [#allocation6], %s4265_s9  ;;  %s4911_s7 = smov [#allocation11]  }
  0x55   : > { %s375_s22 = sadd.s32 %s4266_s26, %s5132_s30  ;;  %s378_s14 = sshll.u32 %s365_s25, 4  ;;  %s5145_s14 = int_to_ptr.vmem [resolvable:$true] %s378_s14 }
  0x56   : > { %s2884_s5 = sshll.u32 %s375_s22, 7  ;;  %s5152_s15 = sshll.u32 %s4911_s7, 4  ;;  %s305_s15 = int_to_ptr.vmem [resolvable:$true] %s5152_s15 }
  0x57   : > { %s5154_s27 = scalar_lea.sflag [#allocation7], %s361_s24  ;;  %p4600_p12 = pneg %p5140_p9 }
  0x59   : > { %s5150_s10 = scalar_lea.hbm %s6090_s1, %s2884_s5  ;;  %s4603_s17 = scalar_lea.hbm %s6090_s1, 12288 }
  0x5a   : > { %s4598_s2 = scalar_lea.hbm %s5150_s10, 384  ;;  %p4604_p1 = scmp.lt.u32.totalorder %s5150_s10, %s6090_s1 }
  0x5b   : > { %p4599_p10 = scmp.ne.s32.totalorder %s5150_s10, %s4598_s2  ;;  %p4605_p4 = scmp.lt.u32.totalorder %s4603_s17, %s4598_s2 }
  0x5c   : > { %p4607_p7 = scmp.lt.u32.totalorder %s4598_s2, %s5150_s10 }
  0x5d   : > { %p4601_p13 = pnand %p4600_p12, %p4599_p10  ;;  %p4606_p0 = por %p4605_p4, %p4604_p1 }
  0x5f   : > { %p4602_p3 = pneg %p4601_p13  ;;  %p4608_p2 = por %p4607_p7, %p4606_p0 }
  0x61   : > { %p4609_p11 = pnand %p4608_p2, %p4602_p3 }
  0x63   : > { %4612 = shalt.err (!%p4609_p11)
}
  0x64   : > { %s4613_s24 = scalar_lea.vmem %s5145_s14, 384  ;;  %s4912_s22 = smov [#allocation6]  }
  0x65   : > { %p4614_p10 = scmp.ne.s32.totalorder %s5145_s14, %s4613_s24  ;;  %s4618_s5 = sshll.u32 %s4912_s22, 4  ;;  %s4619_s5 = int_to_ptr.vmem [resolvable:$false] %s4618_s5 }
  0x66   : > { %s4620_s7 = scalar_lea.vmem %s4619_s5, 768  ;;  %p4621_p6 = scmp.lt.s32.totalorder %s5145_s14, %s4619_s5 }
  0x67   : > { %p4616_p13 = pnand %p4614_p10, %p4600_p12  ;;  %p4622_p4 = scmp.lt.s32.totalorder %s4620_s7, %s4613_s24 }
  0x69   : > { %p4617_p5 = pneg %p4616_p13  ;;  %p4623_p1 = por %p4622_p4, %p4621_p6 }
  0x6b   : > { %p4624_p0 = pnand %p4623_p1, %p4617_p5 }
  0x6d   : > { %4627 = shalt.err (!%p4624_p0)
}
  0x6e   : > { %s6091_s2 = smov 8   ;;  %s6092_s28 = smov 128  }
  0x6f   : > { %4312 = dma.hbm_to_vmem [thread:$0]  (!%p5140_p9), %s5150_s10, 384, %s5145_s14, %s5154_s27, %s6092_s28, %s6092_s28, %s6091_s2  }
  0x70   : > { %s6093_s4 = sld [smem:[#allocation39_spill]] }
  0x76   : > { %s4628_s25 = scalar_lea.hbm %s6093_s4, 2048 }
  0x77   : > { %p4629_p6 = scmp.ne.s32.totalorder %s6093_s4, %s4628_s25  ;;  %p4635_p5 = scmp.lt.u32.totalorder %s4628_s25, %s6093_s4 }
  0x79   : > { %p4631_p2 = pnand %p4629_p6, %p5064_p8 }
  0x7b   : > { %p4632_p11 = pneg %p4631_p2 }
  0x7d   : > { %p4637_p7 = pnand %p4635_p5, %p4632_p11 }
  0x7f   : > { %4640 = shalt.err (!%p4637_p7)
}
  0x80   : > { %s4641_s5 = scalar_lea.vmem %s305_s15, 2048  ;;  %p4649_p10 = scmp.lt.s32.totalorder %s305_s15, %s305_s15 }
  0x81   : > { %p4642_p9 = scmp.ne.s32.totalorder %s305_s15, %s4641_s5  ;;  %p4650_p13 = scmp.lt.s32.totalorder %s4641_s5, %s4641_s5 }
  0x83   : > { %p4644_p12 = pnand %p4642_p9, %p5064_p8  ;;  %p4651_p4 = por %p4650_p13, %p4649_p10 }
  0x85   : > { %p4645_p3 = pneg %p4644_p12 }
  0x87   : > { %p4652_p1 = pnand %p4651_p4, %p4645_p3 }
  0x89   : > { %4655 = shalt.err (!%p4652_p1)
}
  0x8a   : > { %p6094_p0 = scmp.ne.s32.totalorder %s6077_s23, 0  ;;  %s4913_s7 = smov [#allocation12]  }
  0x8b   : > { %s320_s9 = sshll.u32 %s4913_s7, 4  ;;  %s6095_s6 = sld [smem:[#allocation41_spill]]  ;;  %s321_s9 = int_to_ptr.vmem [resolvable:$true] %s320_s9 }
  0x8c   : > { %4302 = dma.hbm_to_vmem [thread:$0]  (!%p6094_p0), %s6093_s4, 2048, %s305_s15, [#allocation10], %s6092_s28, %s6092_s28, %s6091_s2  }
  0x91   : > { %s4656_s26 = scalar_lea.hbm %s6095_s6, 18432 }
  0x92   : > { %p4657_p6 = scmp.ne.s32.totalorder %s6095_s6, %s4656_s26  ;;  %p4663_p5 = scmp.lt.u32.totalorder %s4656_s26, %s6095_s6 }
  0x94   : > { %p4659_p2 = pnand %p4657_p6, %p5064_p8 }
  0x96   : > { %p4660_p11 = pneg %p4659_p2 }
  0x98   : > { %p4665_p7 = pnand %p4663_p5, %p4660_p11 }
  0x9a   : > { %4668 = shalt.err (!%p4665_p7)
}
  0x9b   : > { %s4669_s15 = scalar_lea.vmem %s321_s9, 18432  ;;  %p4677_p10 = scmp.lt.s32.totalorder %s321_s9, %s321_s9 }
  0x9c   : > { %p4670_p9 = scmp.ne.s32.totalorder %s321_s9, %s4669_s15  ;;  %p4678_p13 = scmp.lt.s32.totalorder %s4669_s15, %s4669_s15 }
  0x9e   : > { %p4672_p12 = pnand %p4670_p9, %p5064_p8  ;;  %p4679_p4 = por %p4678_p13, %p4677_p10 }
  0xa0   : > { %p4673_p3 = pneg %p4672_p12 }
  0xa2   : > { %p4680_p1 = pnand %p4679_p4, %p4673_p3 }
  0xa4   : > { %4683 = shalt.err (!%p4680_p1)
}
  0xa5   : > { %4305 = dma.hbm_to_vmem [thread:$0]  (!%p6094_p0), %s6095_s6, 18432, %s321_s9, [#allocation13], %s6092_s28, %s6092_s28, %s6091_s2  }
  0xa6   : > { %s2867_s23 = sadd.s32 4294967294, %s4906_s18   ;;  %s50_s21 = sadd.s32 1, %s4886_s13 }
  0xa7   : > { %p6096_p8 = scmp.eq.s32.totalorder %s5103_s8, 0  ;;  %p57_p6 = scmp.ne.s32.totalorder %s4886_s13, %s4882_s12 }
  0xa8   : > { %p63_p2 = scmp.ne.s32.totalorder %s4882_s12, %s4878_s11  ;;  %p272_p11 = scmp.eq.s32.totalorder %s2867_s23, 7 }
  0xa9   : > { %s5233_s7 = scalar_select %p6096_p8, %s4886_s13, %s50_s21  }
  0xaa   : > { %s337_s17 = sand.u32 1, %s4886_s13   ;;  %p6097_p5 = scmp.eq.s32.totalorder %s4906_s18, 0 }
  0xab   : > { %p6098_p9 = scmp.eq.s32.totalorder %s5038_s19, 0  ;;  %p6100_p3 = scmp.eq.s32.totalorder %s5038_s19, 7 }
  0xac   : > { %p59_p7 = por %p6097_p5, %p57_p6  ;;  %p5254_p0 = por %p272_p11, %p63_p2 }
  0xad   : > { %p5244_p12 = por %p6098_p9, %p63_p2  ;;  %p5250_p10 = por %p6100_p3, %p57_p6 }
  0xae   : > { %s6102_s8 = scalar_select %p5254_p0, 1, 0 }
  0xaf   : > { %s6101_s26 = scalar_select %p5250_p10, 1, 0 }
  0xb0   : > { %s4262_s9 = smul.u32 96, %s337_s17  ;;  %p6103_p13 = scmp.lt.s32.totalorder %s4906_s18, 8 }
  0xb1   : > { %s4263_s24 = smul.u32 12, %s4898_s16  ;;  %s6105_s0 = sld [smem:[#allocation35_spill]] }
  0xb2   : > { %p5261_p4 = pnand %p6103_p13, %p59_p7  ;;  %s341_s5 = scalar_lea.vmem [#allocation3], %s4262_s9 }
  0xb3   : > { %s348_s22 = sadd.s32 %s5132_s30, %s4263_s24  ;;  %s351_s15 = sshll.u32 %s341_s5, 4  ;;  %s5266_s15 = int_to_ptr.vmem [resolvable:$true] %s351_s15 }
  0xb4   : > { %s2881_s10 = sshll.u32 %s348_s22, 7  ;;  %s5273_s1 = scalar_lea.sflag [#allocation4], %s337_s17 }
  0xb5   : > { %p4686_p8 = pneg %p5261_p4 }
  0xb7   : > { %s5271_s21 = scalar_lea.hbm %s6105_s0, %s2881_s10  ;;  %s4689_s22 = scalar_lea.hbm %s6105_s0, 12288 }
  0xb8   : > { %s4684_s4 = scalar_lea.hbm %s5271_s21, 1536  ;;  %p4690_p11 = scmp.lt.u32.totalorder %s5271_s21, %s6105_s0 }
  0xb9   : > { %p4685_p1 = scmp.ne.s32.totalorder %s5271_s21, %s4684_s4  ;;  %p4691_p5 = scmp.lt.u32.totalorder %s4689_s22, %s4684_s4 }
  0xba   : > { %p4693_p9 = scmp.lt.u32.totalorder %s4684_s4, %s5271_s21 }
  0xbb   : > { %p4687_p6 = pnand %p4686_p8, %p4685_p1  ;;  %p4692_p7 = por %p4691_p5, %p4690_p11 }
  0xbd   : > { %p4688_p2 = pneg %p4687_p6  ;;  %p4694_p3 = por %p4693_p9, %p4692_p7 }
  0xbf   : > { %p4695_p13 = pnand %p4694_p3, %p4688_p2 }
  0xc1   : > { %4698 = shalt.err (!%p4695_p13)
}
  0xc2   : > { %s4699_s17 = scalar_lea.vmem %s5266_s15, 1536  ;;  %s4914_s14 = smov [#allocation3]  }
  0xc3   : > { %p4700_p1 = scmp.ne.s32.totalorder %s5266_s15, %s4699_s17  ;;  %s4704_s23 = sshll.u32 %s4914_s14, 4  ;;  %s4705_s23 = int_to_ptr.vmem [resolvable:$false] %s4704_s23 }
  0xc4   : > { %s4706_s9 = scalar_lea.vmem %s4705_s23, 3072  ;;  %p4707_p10 = scmp.lt.s32.totalorder %s5266_s15, %s4705_s23 }
  0xc5   : > { %p4702_p6 = pnand %p4700_p1, %p4686_p8  ;;  %p4708_p11 = scmp.lt.s32.totalorder %s4706_s9, %s4699_s17 }
  0xc7   : > { %p4703_p0 = pneg %p4702_p6  ;;  %p4709_p5 = por %p4708_p11, %p4707_p10 }
  0xc9   : > { %p4710_p7 = pnand %p4709_p5, %p4703_p0 }
  0xcb   : > { %4713 = shalt.err (!%p4710_p7)
}
  0xcc   : > { %s6106_s4 = sld [smem:[#allocation33_spill]]  ;;  %s6107_s24 = sld [smem:[#allocation22_spill]] }
  0xcd   : > { %s6108_s22 = sld [smem:[#allocation21_spill]]  ;;  %s6109_s5 = sld [smem:[#allocation31_spill]] }
  0xce   : > { %4309 = dma.hbm_to_vmem [thread:$0]  (!%p5261_p4), %s5271_s21, 1536, %s5266_s15, %s5273_s1, %s6092_s28, %s6092_s28, %s6091_s2  }
  0xcf   : > { %s122_s20 = sadd.s32 1, %s4862_s29  ;;  %p6110_p10 = scmp.lt.s32.totalorder %s5114_s3, 15 }
  0xd0   : > { %s390_s17 = sand.u32 1, %s4862_s29   ;;  %p6112_p9 = scmp.eq.s32.totalorder %s4906_s18, 0 }
  0xd1   : > { %s6162_s3 = smov (!%p6110_p10, %s5114_s3), 15  ;;  %p6113_p1 = scmp.eq.s32.totalorder %s5038_s19, 0 }
  0xd2   : > { %p6111_p0 = scmp.lt.s32.totalorder %s6106_s4, 15  ;;  %p129_p8 = scmp.ne.s32.totalorder %s4862_s29, %s6107_s24 }
  0xd3   : > { %p135_p2 = scmp.ne.s32.totalorder %s6107_s24, %s6108_s22  ;;  %s4268_s1 = smul.u32 24, %s390_s17 }
  0xd4   : > { %s6164_s4 = smov (!%p6111_p0, %s6106_s4), 15  ;;  %p131_p3 = por %p129_p8, %p6112_p9 }
  0xd5   : > { %s118_s10 = ssub.s32 %s6162_s3, %s6164_s4  ;;  %p5321_p6 = por %p135_p2, %p6113_p1 }
  0xd6   : > { %s119_s14 = sor.u32 %s118_s10, %s6109_s5  ;;  %p6115_p4 = scmp.lt.s32.totalorder %s4906_s18, 8 }
  0xd7   : > { %p120_p13 = scmp.eq.s32.totalorder %s119_s14, 0  ;;  %s4269_s9 = smul.u32 3, %s6162_s3 }
  0xd8   : > { %s6114_s23 = scalar_select %p5321_p6, 1, 0 }
  0xd9   : > { %p5327_p11 = pnand %p6115_p4, %p131_p3  ;;  %s392_s4 = scalar_lea.vmem [#allocation8], %s4268_s1 }
  0xda   : > { %s5332_s21 = scalar_select %p120_p13, %s4862_s29, %s122_s20  }
  0xdb   : > { %s405_s24 = sshll.u32 %s392_s4, 4  ;;  %s402_s22 = sadd.s32 %s4269_s9, %s5132_s30  ;;  %s5335_s24 = int_to_ptr.vmem [resolvable:$true] %s405_s24 }
  0xdc   : > { %s2886_s5 = sshll.u32 %s402_s22, 7  ;;  %s6117_s0 = sld [smem:[#allocation37_spill]] }
  0xdd   : > { %p4716_p7 = pneg %p5327_p11 }
  0xe2   : > { %s5340_s17 = scalar_lea.hbm %s6117_s0, %s2886_s5  ;;  %s4719_s20 = scalar_lea.hbm %s6117_s0, 12288 }
  0xe3   : > { %s4714_s6 = scalar_lea.hbm %s5340_s17, 384  ;;  %p4720_p8 = scmp.lt.u32.totalorder %s5340_s17, %s6117_s0 }
  0xe4   : > { %p4715_p5 = scmp.ne.s32.totalorder %s5340_s17, %s4714_s6  ;;  %p4721_p2 = scmp.lt.u32.totalorder %s4719_s20, %s4714_s6 }
  0xe5   : > { %p4723_p3 = scmp.lt.u32.totalorder %s4714_s6, %s5340_s17 }
  0xe6   : > { %p4717_p10 = pnand %p4716_p7, %p4715_p5  ;;  %p4722_p9 = por %p4721_p2, %p4720_p8 }
  0xe8   : > { %p4718_p0 = pneg %p4717_p10  ;;  %p4724_p13 = por %p4723_p3, %p4722_p9 }
  0xea   : > { %p4725_p1 = pnand %p4724_p13, %p4718_p0 }
  0xec   : > { %4728 = shalt.err (!%p4725_p1)
}
  0xed   : > { %s4729_s4 = scalar_lea.vmem %s5335_s24, 384  ;;  %s4915_s22 = smov [#allocation8]  }
  0xee   : > { %p4730_p4 = scmp.ne.s32.totalorder %s5335_s24, %s4729_s4  ;;  %s4734_s5 = sshll.u32 %s4915_s22, 4  ;;  %s4735_s5 = int_to_ptr.vmem [resolvable:$false] %s4734_s5 }
  0xef   : > { %s4736_s10 = scalar_lea.vmem %s4735_s5, 768  ;;  %p4737_p6 = scmp.lt.s32.totalorder %s5335_s24, %s4735_s5 }
  0xf0   : > { %p4732_p5 = pnand %p4730_p4, %p4716_p7  ;;  %p4738_p8 = scmp.lt.s32.totalorder %s4736_s10, %s4729_s4 }
  0xf2   : > { %p4733_p10 = pneg %p4732_p5  ;;  %p4739_p2 = por %p4738_p8, %p4737_p6 }
  0xf4   : > { %p4740_p9 = pnand %p4739_p2, %p4733_p10 }
  0xf6   : > { %4743 = shalt.err (!%p4740_p9)
}
  0xf7   : > { %4315 = dma.hbm_to_vmem [thread:$0]  (!%p5327_p11), %s5340_s17, 384, %s5335_s24, %s5154_s27, %s6092_s28, %s6092_s28, %s6091_s2  }
  0xf8   : > { %s6118_s6 = sld [smem:[#allocation28_spill]] }
  0xfe   : > { %p6119_p7 = scmp.ne.s32.totalorder %s6118_s6, 0 }
  0xff   : > { %s5374_s14 = sand.u32 (!%p6119_p7), 1, %s4882_s12  }
 0x100   : > { %417 = sbr.rel (%p6119_p7) target bundleno = 1074 (0x432), region = 52  ;;  %s420_s30 = scalar_lea.sflag (!%p6119_p7), [#allocation4], %s5374_s14 }
 0x101   : > { %s4271_s3 = smul.u32 (!%p6119_p7), 96, %s5374_s14 }
 0x103   : > { %s5380_s15 = scalar_lea.vmem (!%p6119_p7), [#allocation3], %s4271_s3 }
 0x107   : > { %4829 = dma.done.wait (%p5244_p12), %s420_s30, 1536  }
 0x108   : > { %4831 = vsyncadd (%p5244_p12), %s420_s30, 4294965760  ;;  %s6120_s27 = sld [smem:[#allocation23_spill]]  ;;  %s6121_s2 = sld [smem:[#allocation32_spill]] }
 0x109   : > { %s428_s28 = sand.u32 1, %s5038_s19  }
 0x10a   : > { %s429_s20 = scalar_lea.sflag [#allocation7], %s428_s28 }
 0x10e   : > { %s430_s24 = sand.u32 1, %s6120_s27   ;;  %p6122_p6 = scmp.ne.s32.totalorder %s6121_s2, 0 }
 0x10f   : > { %s4272_s17 = smul.u32 24, %s430_s24 }
 0x111   : > { %s5388_s1 = scalar_lea.vmem [#allocation6], %s4272_s17 }
 0x112   : > { %4833 = dma.done.wait (%p6122_p6), %s429_s20, 384  }
 0x113   : > { %4835 = vsyncadd (%p6122_p6), %s429_s20, 4294966912  ;;  %s6123_s9 = sld [smem:[#allocation22_spill]]  ;;  %p6124_p12 = scmp.ne.s32.totalorder %s6114_s23, 0 }
 0x119   : > { %s439_s4 = sand.u32 1, %s6123_s9  }
 0x11a   : > { %s4273_s22 = smul.u32 24, %s439_s4 }
 0x11c   : > { %s5395_s25 = scalar_lea.vmem [#allocation8], %s4273_s22 }
 0x11d   : > { %4837 = dma.done.wait (%p6124_p12), %s429_s20, 384  }
 0x11e   : > { %4839 = vsyncadd (%p6124_p12), %s429_s20, 4294966912  ;;  %p6125_p11 = scmp.eq.s32.totalorder %s5038_s19, 0 }
 0x120   : > { %4841 = dma.done.wait (%p6125_p11), [#allocation10], 2432   ;;  %p6126_p0 = pmov %p6125_p11 }
 0x122   : > { %4843 = vsyncadd (%p6126_p0), [#allocation10], 4294964864  ;;  %p6127_p3 = pmov %p6126_p0 }
 0x123   : > { %p6128_p13 = pmov %p6126_p0 }
 0x124   : > { %4845 = dma.done.wait (%p6127_p3), [#allocation13], 18432  }
 0x125   : > { %4847 = vsyncadd (%p6128_p13), [#allocation13], 4294948864  ;;  %v4916_v0 = vmov 0.0|0.0   ;;  %v4917_v1 = vmov 0.0   ;;  %vm4918_vm0 = vmmov 0   ;;  %v506_v2 = vld [vmem:[#allocation11] sm:$0xff] }
 0x126   : > { %3798 = vmatprep.subr.bf16.mxu0 %v4916_v0  ;;  %526 = vst [vmem:[#allocation2] sm:$0xff] %v4917_v1  ;;  %527 = vst [vmem:[#allocation2 + $0x98] sm:$0xff] %v4917_v1  ;;  %3248 = vmatprep.mubr.msk.f32.mxu0 %vm4918_vm0, %v4917_v1  ;;  %v507_v3 = vld [vmem:[#allocation11 + $0x8] sm:$0xff]  ;;  %v508_v4 = vld [vmem:[#allocation11 + $0x10] sm:$0xff]  ;;  %s6129_s5 = sld [smem:[#allocation40_spill]]  ;;  %s6130_s10 = sld [smem:[#allocation25_spill]] }
 0x127   : > { %v5414_v5 = vpack.c.bf16 %v507_v3, %v506_v2  ;;  %v509_v6 = vld [vmem:[#allocation11 + $0x18] sm:$0xff]  ;;  %v510_v8 = vld [vmem:[#allocation11 + $0x20] sm:$0xff]  ;;  %v511_v9 = vld [vmem:[#allocation11 + $0x28] sm:$0xff]  ;;  %s6131_s17 = sld [smem:[#allocation42_spill]]  ;;  %s5905_s20 = scalar_lea.vmem [#allocation14], %s4271_s3 }
 0x128   : > { %v5417_v7 = vpack.c.bf16 %v509_v6, %v508_v4  ;;  %v5421_v10 = vpack.c.bf16 %v511_v9, %v510_v8  ;;  %v512_v11 = vld [vmem:[#allocation11 + $0x30] sm:$0xff]  ;;  %v513_v12 = vld [vmem:[#allocation11 + $0x38] sm:$0xff]  ;;  %v514_v14 = vld [vmem:[#allocation11 + $0x40] sm:$0xff]  ;;  %s6132_s3 = sld [smem:[#allocation26_spill]]  ;;  %p6134_p10 = scmp.ne.s32.totalorder %s6101_s26, 0 }
 0x129   : > { %3800 = vmatpush3.bf16.msra.mxu0 %v5414_v5  ;;  %v5425_v13 = vpack.c.bf16 %v513_v12, %v512_v11  ;;  %v515_v15 = vld [vmem:[#allocation11 + $0x48] sm:$0xff]  ;;  %v516_v17 = vld [vmem:[#allocation11 + $0x50] sm:$0xff]  ;;  %v517_v18 = vld [vmem:[#allocation11 + $0x58] sm:$0xff] }
 0x12a   : > { %3801 = vmatprep.subr.bf16.mxu0 %v4916_v0  ;;  %v5429_v16 = vpack.c.bf16 %v515_v15, %v514_v14  ;;  %v5433_v19 = vpack.c.bf16 %v517_v18, %v516_v17  ;;  %v518_v20 = vld [vmem:[#allocation11 + $0x60] sm:$0xff]  ;;  %v519_v21 = vld [vmem:[#allocation11 + $0x68] sm:$0xff]  ;;  %v520_v23 = vld [vmem:[#allocation11 + $0x70] sm:$0xff] }
 0x12b   : > { %v5437_v22 = vpack.c.bf16 %v519_v21, %v518_v20  ;;  %v521_v24 = vld [vmem:[#allocation11 + $0x78] sm:$0xff]  ;;  %v534_v26 = vld [vmem:[%s5388_s1] sm:$0xff]  ;;  %v535_v27 = vld [vmem:[%s5388_s1 + $0x8] sm:$0xff] }
 0x12c   : > { %v5441_v25 = vpack.c.bf16 %v521_v24, %v520_v23  ;;  %v536_v28 = vld [vmem:[%s5388_s1 + $0x10] sm:$0xff]  ;;  %v660_v29 = vld [vmem:[%s5380_s15] sm:$0xff]  ;;  %v663_v32 = vld [vmem:[%s5380_s15 + $0x18] sm:$0xff]  ;;  %p528_p1 = scmp.gt.s32.totalorder %s6130_s10, 0  ;;  %p531_p4 = scmp.lt.s32.totalorder %s6130_s10, 3 }
 0x12d   : > { %3803 = vmatpush3.bf16.msra.mxu0 %v5417_v7  ;;  %v661_v30 = vld [vmem:[%s5380_s15 + $0x8] sm:$0xff]  ;;  %v662_v31 = vld [vmem:[%s5380_s15 + $0x10] sm:$0xff]  ;;  %v664_v33 = vld [vmem:[%s5380_s15 + $0x20] sm:$0xff]  ;;  %s4274_s1 = smul.u32 12, %s6130_s10 }
 0x12e   : > { %3804 = vmatprep.subr.bf16.mxu0 %v4916_v0  ;;  %v665_v34 = vld [vmem:[%s5380_s15 + $0x28] sm:$0xff]  ;;  %v666_v35 = vld [vmem:[%s5380_s15 + $0x30] sm:$0xff]  ;;  %v667_v36 = vld [vmem:[%s5380_s15 + $0x38] sm:$0xff]  ;;  %s529_s6 = scalar_select %p528_p1, 1, 0 }
 0x12f   : > { %v668_v37 = vld [vmem:[%s5380_s15 + $0x40] sm:$0xff]  ;;  %v669_v38 = vld [vmem:[%s5380_s15 + $0x48] sm:$0xff]  ;;  %v670_v39 = vld [vmem:[%s5380_s15 + $0x50] sm:$0xff]  ;;  %s5727_s27 = scalar_select %p531_p4, 1, 0 }
 0x130   : > { %v671_v40 = vld [vmem:[%s5380_s15 + $0x58] sm:$0xff]  ;;  %v929_v41 = vld [vmem:[%s5395_s25] sm:$0xff]  ;;  %v1091_v45 = vld [vmem:[#allocation12 + $0x88] sm:$0xff]  ;;  %s530_s30 = scvt.s32.f32 %s529_s6  ;;  %s4275_s9 = smul.u32 48, %s6132_s3 }
 0x131   : > { %3806 = vmatpush3.bf16.msra.mxu0 %v5421_v10  ;;  %v930_v42 = vld [vmem:[%s5395_s25 + $0x8] sm:$0xff]  ;;  %v931_v43 = vld [vmem:[%s5395_s25 + $0x10] sm:$0xff]  ;;  %v1092_v47 = vld [vmem:[#allocation12 + $0x90] sm:$0xff]  ;;  %s533_s2 = scvt.s32.f32 %s5727_s27  ;;  %s2698_s25 = sshll.u32 %s5905_s20, 4  ;;  %s5943_s25 = int_to_ptr.vmem [resolvable:$true] %s2698_s25 }
 0x132   : > { %3807 = vmatprep.subr.bf16.mxu0 %v4916_v0  ;;  %v1090_v44 = vld [vmem:[#allocation12 + $0x80] sm:$0xff]  ;;  %v1093_v48 = vld [vmem:[#allocation12 + $0x98] sm:$0xff]  ;;  %v1095_v51 = vld [vmem:[#allocation12 + $0xa8] sm:$0xff]  ;;  %s2695_s4 = sadd.s32 %s4275_s9, %s4274_s1  ;;  %s2682_s6 = scalar_lea.sflag [#allocation5], %s5374_s14 }
 0x133   : > { %v3878_v46 = vpack.c.bf16 %v1091_v45, %v1090_v44  ;;  %v3882_v49 = vpack.c.bf16 %v1093_v48, %v1092_v47  ;;  %v1094_v50 = vld [vmem:[#allocation12 + $0xa0] sm:$0xff]  ;;  %v1096_v53 = vld [vmem:[#allocation12 + $0xb0] sm:$0xff]  ;;  %v1097_v54 = vld [vmem:[#allocation12 + $0xb8] sm:$0xff]  ;;  %s2895_s22 = sshll.u32 %s2695_s4, 7 }
 0x134   : > { %v3886_v52 = vpack.c.bf16 %v1095_v51, %v1094_v50  ;;  %v3890_v55 = vpack.c.bf16 %v1097_v54, %v1096_v53  ;;  %v1098_v56 = vld [vmem:[#allocation12 + $0xc0] sm:$0xff]  ;;  %v1099_v57 = vld [vmem:[#allocation12 + $0xc8] sm:$0xff]  ;;  %v1100_v59 = vld [vmem:[#allocation12 + $0xd0] sm:$0xff] }
 0x135   : > { %3809 = vmatpush3.bf16.msra.mxu0 %v5425_v13  ;;  %v3894_v58 = vpack.c.bf16 %v1099_v57, %v1098_v56  ;;  %v1101_v60 = vld [vmem:[#allocation12 + $0xd8] sm:$0xff]  ;;  %v1102_v62 = vld [vmem:[#allocation12 + $0xe0] sm:$0xff]  ;;  %v1103_v63 = vld [vmem:[#allocation12 + $0xe8] sm:$0xff] }
 0x136   : > { %3810 = vmatprep.subr.bf16.mxu0 %v4916_v0  ;;  %v3898_v61 = vpack.c.bf16 %v1101_v60, %v1100_v59  ;;  %v1105_v2 = vld [vmem:[#allocation12 + $0xf8] sm:$0xff]  ;;  %v1535_v4 = vld [vmem:[#allocation12 + $0x180] sm:$0xff]  ;;  %v1540_v11 = vld [vmem:[#allocation12 + $0x1a8] sm:$0xff] }
 0x137   : > { %v1538_v8 = vld [vmem:[#allocation12 + $0x198] sm:$0xff]  ;;  %v1062_v14 = vld [vmem:[#allocation12 + $0x8] sm:$0xff]  ;;  %v1541_v15 = vld [vmem:[#allocation12 + $0x1b0] sm:$0xff] }
 0x138   : > { %v1544_v20 = vld [vmem:[#allocation12 + $0x1c8] sm:$0xff]  ;;  %v1546_v23 = vld [vmem:[#allocation12 + $0x1d8] sm:$0xff] }
 0x139   : > { %3812 = vmatpush3.bf16.msra.mxu0 %v5429_v16 }
 0x13a   : > { %3813 = vmatprep.subr.bf16.mxu0 %v4916_v0 }
 0x13d   : > { %3815 = vmatpush3.bf16.msra.mxu0 %v5433_v19 }
 0x13e   : > { %3816 = vmatprep.subr.bf16.mxu0 %v4916_v0 }
 0x141   : > { %3818 = vmatpush3.bf16.msra.mxu0 %v5437_v22 }
 0x142   : > { %3819 = vmatprep.subr.bf16.mxu0 %v4916_v0 }
 0x145   : > { %3821 = vmatpush3.bf16.msra.mxu0 %v5441_v25 }
 0x146   : > { %3823 = vmatprep.subr.bf16.mxu0 %v5414_v5 }
 0x148   : > { %3249 = vmatmul.mubr.f32.vlgmr.msra.gmra.mrb[0].mxu0 %v534_v26  ;;  %v1548_v26 = vld [vmem:[#allocation12 + $0x1e8] sm:$0xff] }
 0x149   : > { %3825 = vmatpush3.bf16.msra.mxu0 %v5414_v5  ;;  %3251 = vmatprep.mubr.msk.f32.mxu0 %vm4918_vm0, %v4917_v1 }
 0x14a   : > { %3827 = vmatprep.subr.bf16.mxu0 %v5417_v7 }
 0x14c   : > { %3252 = vmatmul.mubr.f32.gmra.mrb[2].mxu0 %v535_v27 }
 0x14d   : > { %3829 = vmatpush3.bf16.msra.mxu0 %v5417_v7  ;;  %3254 = vmatprep.mubr.msk.f32.mxu0 %vm4918_vm0, %v4917_v1 }
 0x14e   : > { %3831 = vmatprep.subr.bf16.mxu0 %v5421_v10 }
 0x150   : > { %3255 = vmatmul.mubr.f32.gmra.mrb[4].mxu0 %v536_v28  ;;  %v1549_v28 = vld [vmem:[#allocation12 + $0x1f0] sm:$0xff] }
 0x151   : > { %3833 = vmatpush3.bf16.msra.mxu0 %v5421_v10  ;;  %3289 = vmatprep.mubr.f32.mxu0 %v660_v29  ;;  %v1550_v29 = vld [vmem:[#allocation12 + $0x1f8] sm:$0xff] }
 0x152   : > { %3835 = vmatprep.subr.bf16.mxu0 %v5425_v13 }
 0x155   : > { %3837 = vmatpush3.bf16.msra.mxu0 %v5425_v13 }
 0x156   : > { %3839 = vmatprep.subr.bf16.mxu0 %v5429_v16 }
 0x159   : > { %3841 = vmatpush3.bf16.msra.mxu0 %v5429_v16 }
 0x15a   : > { %3843 = vmatprep.subr.bf16.mxu0 %v5433_v19 }
 0x15d   : > { %3845 = vmatpush3.bf16.msra.mxu0 %v5433_v19 }
 0x15e   : > { %3847 = vmatprep.subr.bf16.mxu0 %v5437_v22 }
 0x161   : > { %3849 = vmatpush3.bf16.msra.mxu0 %v5437_v22 }
 0x162   : > { %3851 = vmatprep.subr.bf16.mxu0 %v5441_v25 }
 0x165   : > { %3853 = vmatpush3.bf16.msra.mxu0 %v5441_v25 }
 0x166   : > { %3854 = vmatprep.subr.bf16.mxu0 %v4916_v0 }
 0x168   : > { %3290 = vmatmul.mubr.f32.vlgmr.msra.gmra.mrb[6].mxu0 %v661_v30  ;;  %v4002_v30 = vpack.c.bf16 %v1550_v29, %v1549_v28 }
 0x169   : > { %3856 = vmatpush3.bf16.msra.mxu0 %v5414_v5  ;;  %3292 = vmatprep.mubr.f32.mxu0 %v662_v31  ;;  %v1536_v5 = vld [vmem:[#allocation12 + $0x188] sm:$0xff]  ;;  %v1701_v31 = vld [vmem:[#allocation12 + $0x200] sm:$0xff] }
 0x16a   : > { %3857 = vmatprep.subr.bf16.mxu0 %v4916_v0  ;;  %v3974_v6 = vpack.c.bf16 %v1536_v5, %v1535_v4 }
 0x16c   : > { %3293 = vmatmul.mubr.f32.gmra.mrb[8].mxu0 %v663_v32  ;;  %3975 = vmatprep.subr.bf16.mxu1 %v3974_v6  ;;  %v1702_v32 = vld [vmem:[#allocation12 + $0x208] sm:$0xff] }
 0x16d   : > { %3859 = vmatpush3.bf16.msra.mxu0 %v5417_v7  ;;  %3295 = vmatprep.mubr.f32.mxu0 %v664_v33  ;;  %v1537_v7 = vld [vmem:[#allocation12 + $0x190] sm:$0xff]  ;;  %v5508_v33 = vpack.c.bf16 %v1702_v32, %v1701_v31 }
 0x16e   : > { %3860 = vmatprep.subr.bf16.mxu0 %v4916_v0  ;;  %3977 = vmatpush3.bf16.msra.mxu1 %v3974_v6  ;;  %v3978_v9 = vpack.c.bf16 %v1538_v8, %v1537_v7  ;;  %v653_v7 = vstv %s530_s30  ;;  %s4744_s30 = scalar_lea.vmem %s5943_s25, 1536 }
 0x16f   : > { %p4745_p5 = scmp.ne.s32.totalorder %s5943_s25, %s4744_s30 }
 0x170   : > { %3296 = vmatmul.mubr.f32.gmra.mrb[10].mxu0 %v665_v34  ;;  %3979 = vmatprep.subr.bf16.mxu1 %v3978_v9  ;;  %v5514_v34 = vld [vmem:[%s6129_s5] ss:$0 sm:$0xff]  ;;  %s6133_s5 = sld [smem:[#allocation43_spill]] }
 0x171   : > { %3862 = vmatpush3.bf16.msra.mxu0 %v5421_v10  ;;  %3298 = vmatprep.mubr.f32.mxu0 %v666_v35  ;;  %v1539_v10 = vld [vmem:[#allocation12 + $0x1a0] sm:$0xff]  ;;  %p4746_p8 = pnand %p4745_p5, %p6134_p10 }
 0x172   : > { %3863 = vmatprep.subr.bf16.mxu0 %v4916_v0  ;;  %3981 = vmatpush3.bf16.msra.mxu1 %v3978_v9  ;;  %v3982_v12 = vpack.c.bf16 %v1540_v11, %v1539_v10 }
 0x173   : > { %p4747_p2 = pneg %p4746_p8 }
 0x174   : > { %3299 = vmatmul.mubr.f32.gmra.mrb[12].mxu0 %v667_v36  ;;  %3983 = vmatprep.subr.bf16.mxu1 %v3982_v12 }
 0x175   : > { %3865 = vmatpush3.bf16.msra.mxu0 %v5425_v13  ;;  %3301 = vmatprep.mubr.f32.mxu0 %v668_v37  ;;  %v1061_v13 = vld [vmem:[#allocation12] sm:$0xff] }
 0x176   : > { %3866 = vmatprep.subr.bf16.mxu0 %v4916_v0  ;;  %3985 = vmatpush3.bf16.msra.mxu1 %v3982_v12  ;;  %v5505_v17 = vpack.c.bf16 %v1062_v14, %v1061_v13  ;;  %s5941_s10 = scalar_lea.hbm %s6133_s5, %s2895_s22 }
 0x178   : > { %3302 = vmatmul.mubr.f32.gmra.mrb[14].mxu0 %v669_v38 }
 0x179   : > { %3868 = vmatpush3.bf16.msra.mxu0 %v5429_v16  ;;  %3304 = vmatprep.mubr.f32.mxu0 %v670_v39  ;;  %v1542_v16 = vld [vmem:[#allocation12 + $0x1b8] sm:$0xff] }
 0x17a   : > { %3869 = vmatprep.subr.bf16.mxu0 %v4916_v0  ;;  %v3986_v18 = vpack.c.bf16 %v1542_v16, %v1541_v15  ;;  %v5534_v16 = vld [vmem:[#allocation9 + $0x8] sm:$0xff] }
 0x17c   : > { %3305 = vmatmul.mubr.f32.gmra.mrb[16].mxu0 %v671_v40  ;;  %3987 = vmatprep.subr.bf16.mxu1 %v3986_v18 }
 0x17d   : > { %3871 = vmatpush3.bf16.msra.mxu0 %v5433_v19  ;;  %3339 = vmatprep.mubr.msk.f32.mxu0 %vm4918_vm0, %v4917_v1  ;;  %v1543_v19 = vld [vmem:[#allocation12 + $0x1c0] sm:$0xff] }
 0x17e   : > { %3872 = vmatprep.subr.bf16.mxu0 %v4916_v0  ;;  %3989 = vmatpush3.bf16.msra.mxu1 %v3986_v18  ;;  %v3990_v21 = vpack.c.bf16 %v1544_v20, %v1543_v19 }
 0x180   : > { %3991 = vmatprep.subr.bf16.mxu1 %v3990_v21 }
 0x181   : > { %3874 = vmatpush3.bf16.msra.mxu0 %v5437_v22  ;;  %v1545_v22 = vld [vmem:[#allocation12 + $0x1d0] sm:$0xff] }
 0x182   : > { %3875 = vmatprep.subr.bf16.mxu0 %v4916_v0  ;;  %v3902_v0 = vpack.c.bf16 %v1103_v63, %v1102_v62  ;;  %3993 = vmatpush3.bf16.msra.mxu1 %v3990_v21  ;;  %v3994_v24 = vpack.c.bf16 %v1546_v23, %v1545_v22  ;;  %v1063_v23 = vld [vmem:[#allocation12 + $0x10] sm:$0xff] }
 0x184   : > { %3995 = vmatprep.subr.bf16.mxu1 %v3994_v24 }
 0x185   : > { %3877 = vmatpush3.bf16.msra.mxu0 %v5441_v25  ;;  %v1547_v25 = vld [vmem:[#allocation12 + $0x1e0] sm:$0xff] }
 0x186   : > { %3879 = vmatprep.subr.bf16.mxu0 %v3878_v46  ;;  %3997 = vmatpush3.bf16.msra.mxu1 %v3994_v24  ;;  %v3998_v27 = vpack.c.bf16 %v1548_v26, %v1547_v25  ;;  %v1064_v24 = vld [vmem:[#allocation12 + $0x18] sm:$0xff] }
 0x188   : > { %3340 = vmatmul.mubr.f32.vlgmr.msra.gmra.mrb[18].mxu0 %v929_v41  ;;  %3999 = vmatprep.subr.bf16.mxu1 %v3998_v27 }
 0x189   : > { %3342 = vmatprep.mubr.msk.f32.mxu0 %vm4918_vm0, %v4917_v1  ;;  %3881 = vmatpush3.bf16.msra.mxu0 %v3878_v46 }
 0x18a   : > { %3883 = vmatprep.subr.bf16.mxu0 %v3882_v49  ;;  %4001 = vmatpush3.bf16.msra.mxu1 %v3998_v27 }
 0x18b   : > { %4003 = vmatprep.subr.bf16.mxu1 %v4002_v30 }
 0x18c   : > { %3343 = vmatmul.mubr.f32.gmra.mrb[20].mxu0 %v930_v42 }
 0x18d   : > { %3345 = vmatprep.mubr.msk.f32.mxu0 %vm4918_vm0, %v4917_v1  ;;  %3885 = vmatpush3.bf16.msra.mxu0 %v3882_v49  ;;  %v1104_v1 = vld [vmem:[#allocation12 + $0xf0] sm:$0xff] }
 0x18e   : > { %3887 = vmatprep.subr.bf16.mxu0 %v3886_v52  ;;  %v3906_v3 = vpack.c.bf16 %v1105_v2, %v1104_v1  ;;  %4005 = vmatpush3.bf16.msra.mxu1 %v4002_v30 }
 0x18f   : > { %4007 = vmatprep.subr.bf16.mxu1 %v5508_v33 }
 0x190   : > { %3346 = vmatmul.mubr.f32.gmra.mrb[22].mxu0 %v931_v43 }
 0x191   : > { %3889 = vmatpush3.bf16.msra.mxu0 %v3886_v52 }
 0x192   : > { %3891 = vmatprep.subr.bf16.mxu0 %v3890_v55 }
 0x195   : > { %3893 = vmatpush3.bf16.msra.mxu0 %v3890_v55 }
 0x196   : > { %3895 = vmatprep.subr.bf16.mxu0 %v3894_v58 }
 0x199   : > { %3897 = vmatpush3.bf16.msra.mxu0 %v3894_v58 }
 0x19a   : > { %3899 = vmatprep.subr.bf16.mxu0 %v3898_v61 }
 0x19d   : > { %3901 = vmatpush3.bf16.msra.mxu0 %v3898_v61 }
 0x19e   : > { %3903 = vmatprep.subr.bf16.mxu0 %v3902_v0 }
 0x1a1   : > { %3905 = vmatpush3.bf16.msra.mxu0 %v3902_v0 }
 0x1a2   : > { %3907 = vmatprep.subr.bf16.mxu0 %v3906_v3 }
 0x1a5   : > { %3909 = vmatpush3.bf16.msra.mxu0 %v3906_v3  ;;  %v5523_v3 = vld [vmem:[#allocation9] sm:$0xff] }
 0x1a6   : > { %3911 = vmatprep.subr.bf16.mxu0 %v5505_v17 }
 0x21b   : > { %v609_v35 = vpop.f32.mrb[0].mxu0 }
 0x21c   : > { %v610_v36 = vadd.f32 %v5514_v34, %v609_v35  ;;  %v3250_v37 = vpop.f32.mrb[1].mxu0  ;;  %v5545_v35 = vld [vmem:[#allocation9 + $0x10] sm:$0xff] }
 0x21e   : > { %v623_v38 = vmin.f32 %v610_v36, 20.0 }
 0x21f   : > { %v614_v39 = vpop.f32.mrb[2].mxu0 }
 0x220   : > { %v626_v40 = vmul.f32 1.442695, %v623_v38  ;;  %v615_v41 = vadd.f32 %v5514_v34, %v614_v39  ;;  %v3253_v42 = vpop.f32.mrb[3].mxu0  ;;  %v3914_v38 = vpack.c.bf16 %v1064_v24, %v1063_v23 }
 0x222   : > { %4450 = vpow2.f32 %v626_v40  ;;  %v624_v43 = vmin.f32 %v615_v41, 20.0 }
 0x223   : > { %v619_v44 = vpop.f32.mrb[4].mxu0 }
 0x224   : > { %v628_v45 = vmul.f32 1.442695, %v624_v43  ;;  %v620_v46 = vadd.f32 %v5514_v34, %v619_v44  ;;  %v3256_v47 = vpop.f32.mrb[5].mxu0  ;;  %v1065_v44 = vld [vmem:[#allocation12 + $0x20] sm:$0xff] }
 0x226   : > { %4452 = vpow2.f32 %v628_v45  ;;  %v625_v48 = vmin.f32 %v620_v46, 20.0  ;;  %v1066_v45 = vld [vmem:[#allocation12 + $0x28] sm:$0xff] }
 0x228   : > { %v630_v49 = vmul.f32 1.442695, %v625_v48 }
 0x22a   : > { %4454 = vpow2.f32 %v630_v49 }
 0x22c   : > { %v4451_v50 = vpop.eup %4450 }
 0x22d   : > { %v632_v51 = vadd.f32 2.0, %v4451_v50 }
 0x22f   : > { %v635_v52 = vmul.f32 %v4451_v50, %v632_v51 }
 0x230   : > { %v4453_v53 = vpop.eup %4452 }
 0x231   : > { %v641_v54 = vadd.f32 2.0, %v635_v52  ;;  %v633_v55 = vadd.f32 2.0, %v4453_v53  ;;  %v638_v63 = vmul.f32 %v635_v52, %v610_v36 }
 0x233   : > { %4456 = vrcp.f32 %v641_v54  ;;  %v636_v56 = vmul.f32 %v4453_v53, %v633_v55  ;;  %v3918_v54 = vpack.c.bf16 %v1066_v45, %v1065_v44 }
 0x234   : > { %v4455_v57 = vpop.eup %4454 }
 0x235   : > { %v642_v58 = vadd.f32 2.0, %v636_v56  ;;  %v634_v59 = vadd.f32 2.0, %v4455_v57  ;;  %v639_v11 = vmul.f32 %v636_v56, %v615_v41 }
 0x237   : > { %4458 = vrcp.f32 %v642_v58  ;;  %v637_v60 = vmul.f32 %v4455_v57, %v634_v59  ;;  %v1067_v57 = vld [vmem:[#allocation12 + $0x30] sm:$0xff]  ;;  %v1068_v58 = vld [vmem:[#allocation12 + $0x38] sm:$0xff] }
 0x239   : > { %v643_v61 = vadd.f32 2.0, %v637_v60  ;;  %v640_v28 = vmul.f32 %v637_v60, %v620_v46 }
 0x23b   : > { %4460 = vrcp.f32 %v643_v61  ;;  %v3291_v62 = vpop.f32.mrb[6].mxu0 }
 0x23c   : > { %v5521_v0 = vadd.f32 %v3291_v62, %v5514_v34  ;;  %v738_v1 = vpop.f32.mrb[7].mxu0 }
 0x23d   : > { %v4457_v2 = vpop.eup %4456  ;;  %v5526_v4 = vadd.f32 %v5514_v34, %v738_v1 }
 0x23e   : > { %v647_v5 = vmul.f32 %v4457_v2, %v638_v63  ;;  %v798_v6 = vmin.f32 %v5521_v0, 20.0 }
 0x23f   : > { %v797_v8 = vmin.f32 %v5526_v4, 20.0  ;;  %v3294_v9 = vpop.f32.mrb[8].mxu0 }
 0x240   : > { %v650_v10 = vmul.f32 %v647_v5, %v5523_v3  ;;  %v811_v12 = vmul.f32 1.442695, %v798_v6  ;;  %v5532_v13 = vadd.f32 %v3294_v9, %v5514_v34  ;;  %v748_v14 = vpop.f32.mrb[9].mxu0 }
 0x241   : > { %v4459_v15 = vpop.eup %4458  ;;  %v809_v18 = vmul.f32 1.442695, %v797_v8  ;;  %v5537_v19 = vadd.f32 %v5514_v34, %v748_v14 }
 0x242   : > { %v654_v20 = vmul.f32 %v653_v7, %v650_v10  ;;  %v648_v21 = vmul.f32 %v4459_v15, %v639_v11  ;;  %4462 = vpow2.f32 %v811_v12  ;;  %v800_v22 = vmin.f32 %v5532_v13, 20.0  ;;  %v1069_v11 = vld [vmem:[#allocation12 + $0x40] sm:$0xff]  ;;  %v1070_v12 = vld [vmem:[#allocation12 + $0x48] sm:$0xff] }
 0x243   : > { %4464 = vpow2.f32 %v809_v18  ;;  %v799_v25 = vmin.f32 %v5537_v19, 20.0  ;;  %v3297_v26 = vpop.f32.mrb[10].mxu0 }
 0x244   : > { %657 = vst [vmem:[#allocation2 + $0x8] sm:$0xff] %v654_v20  ;;  %v651_v27 = vmul.f32 %v648_v21, %v5534_v16  ;;  %v815_v29 = vmul.f32 1.442695, %v800_v22  ;;  %v5543_v30 = vadd.f32 %v3297_v26, %v5514_v34  ;;  %v758_v31 = vpop.f32.mrb[11].mxu0  ;;  %3380 = vmatprep.mubr.f32.mxu0 %v654_v20 }
 0x245   : > { %v4461_v32 = vpop.eup %4460  ;;  %v813_v36 = vmul.f32 1.442695, %v799_v25  ;;  %v5548_v37 = vadd.f32 %v5514_v34, %v758_v31 }
 0x246   : > { %v655_v39 = vmul.f32 %v653_v7, %v651_v27  ;;  %v649_v40 = vmul.f32 %v4461_v32, %v640_v28  ;;  %4466 = vpow2.f32 %v815_v29  ;;  %v802_v41 = vmin.f32 %v5543_v30, 20.0 }
 0x247   : > { %4468 = vpow2.f32 %v813_v36  ;;  %v801_v42 = vmin.f32 %v5548_v37, 20.0  ;;  %v3300_v43 = vpop.f32.mrb[12].mxu0  ;;  %v3926_v28 = vpack.c.bf16 %v1070_v12, %v1069_v11  ;;  %v1071_v36 = vld [vmem:[#allocation12 + $0x50] sm:$0xff] }
 0x248   : > { %658 = vst [vmem:[#allocation2 + $0x10] sm:$0xff] %v655_v39  ;;  %v652_v46 = vmul.f32 %v649_v40, %v5545_v35  ;;  %v819_v47 = vmul.f32 1.442695, %v802_v41  ;;  %v5554_v48 = vadd.f32 %v3300_v43, %v5514_v34  ;;  %v768_v49 = vpop.f32.mrb[13].mxu0  ;;  %3381 = vmatmul.mubr.f32.vlgmr.msra.gmra.mrb[24].mxu0 %v655_v39 }
 0x249   : > { %v817_v50 = vmul.f32 1.442695, %v801_v42  ;;  %v5557_v51 = vadd.f32 %v5514_v34, %v768_v49  ;;  %3913 = vmatpush3.bf16.msra.mxu0 %v5505_v17 }
 0x24a   : > { %v656_v52 = vmul.f32 %v653_v7, %v652_v46  ;;  %4470 = vpow2.f32 %v819_v47  ;;  %v804_v53 = vmin.f32 %v5554_v48, 20.0  ;;  %3915 = vmatprep.subr.bf16.mxu0 %v3914_v38  ;;  %v3922_v7 = vpack.c.bf16 %v1068_v58, %v1067_v57 }
 0x24b   : > { %4472 = vpow2.f32 %v817_v50  ;;  %v803_v55 = vmin.f32 %v5557_v51, 20.0  ;;  %v3303_v56 = vpop.f32.mrb[14].mxu0 }
 0x24c   : > { %v4463_v59 = vpop.eup %4462  ;;  %659 = vst [vmem:[#allocation2 + $0x18] sm:$0xff] %v656_v52  ;;  %v823_v60 = vmul.f32 1.442695, %v804_v53  ;;  %v5563_v61 = vadd.f32 %v3303_v56, %v5514_v34  ;;  %v778_v62 = vpop.f32.mrb[15].mxu0  ;;  %3383 = vmatprep.mubr.f32.mxu0 %v656_v52  ;;  %v1073_v52 = vld [vmem:[#allocation12 + $0x60] sm:$0xff]  ;;  %v1074_v53 = vld [vmem:[#allocation12 + $0x68] sm:$0xff] }
 0x24d   : > { %v4465_v17 = vpop.eup %4464  ;;  %v834_v63 = vadd.f32 2.0, %v4463_v59  ;;  %v821_v1 = vmul.f32 1.442695, %v803_v55  ;;  %v5566_v2 = vadd.f32 %v5514_v34, %v778_v62  ;;  %3917 = vmatpush3.bf16.msra.mxu0 %v3914_v38  ;;  %v1072_v38 = vld [vmem:[#allocation12 + $0x58] sm:$0xff] }
 0x24e   : > { %v833_v5 = vadd.f32 2.0, %v4465_v17  ;;  %4474 = vpow2.f32 %v823_v60  ;;  %v806_v6 = vmin.f32 %v5563_v61, 20.0  ;;  %3919 = vmatprep.subr.bf16.mxu0 %v3918_v54  ;;  %v3930_v47 = vpack.c.bf16 %v1072_v38, %v1071_v36  ;;  %v1370_v36 = vld [vmem:[#allocation12 + $0x108] sm:$0xff] }
 0x24f   : > { %v5569_v8 = vmul.f32 %v4463_v59, %v834_v63  ;;  %4476 = vpow2.f32 %v821_v1  ;;  %v805_v9 = vmin.f32 %v5566_v2, 20.0  ;;  %v3306_v10 = vpop.f32.mrb[16].mxu0 }
 0x250   : > { %v4467_v14 = vpop.eup %4466  ;;  %v5572_v15 = vmul.f32 %v4465_v17, %v833_v5  ;;  %v827_v18 = vmul.f32 1.442695, %v806_v6  ;;  %v5575_v20 = vadd.f32 %v3306_v10, %v5514_v34  ;;  %v788_v21 = vpop.f32.mrb[17].mxu0  ;;  %v3934_v17 = vpack.c.bf16 %v1074_v53, %v1073_v52  ;;  %v1075_v5 = vld [vmem:[#allocation12 + $0x70] sm:$0xff]  ;;  %v1076_v6 = vld [vmem:[#allocation12 + $0x78] sm:$0xff] }
 0x251   : > { %v4469_v22 = vpop.eup %4468  ;;  %v870_v23 = vadd.f32 2.0, %v5569_v8  ;;  %v836_v24 = vadd.f32 2.0, %v4467_v14  ;;  %v825_v25 = vmul.f32 1.442695, %v805_v9  ;;  %3921 = vmatpush3.bf16.msra.mxu0 %v3918_v54  ;;  %v5581_v32 = vadd.f32 %v5514_v34, %v788_v21 }
 0x252   : > { %v869_v26 = vadd.f32 2.0, %v5572_v15  ;;  %v835_v27 = vadd.f32 2.0, %v4469_v22  ;;  %4478 = vpow2.f32 %v827_v18  ;;  %3923 = vmatprep.subr.bf16.mxu0 %v3922_v7  ;;  %v808_v31 = vmin.f32 %v5575_v20, 20.0 }
 0x253   : > { %4480 = vrcp.f32 %v870_v23  ;;  %v848_v29 = vmul.f32 %v4467_v14, %v836_v24  ;;  %v807_v50 = vmin.f32 %v5581_v32, 20.0  ;;  %v858_v9 = vmul.f32 %v5569_v8, %v5521_v0 }
 0x254   : > { %v4471_v39 = vpop.eup %4470  ;;  %4482 = vrcp.f32 %v869_v26  ;;  %v5583_v40 = vmul.f32 %v4469_v22, %v835_v27  ;;  %v831_v46 = vmul.f32 1.442695, %v808_v31  ;;  %v857_v18 = vmul.f32 %v5572_v15, %v5526_v4  ;;  %v1369_v15 = vld [vmem:[#allocation12 + $0x100] sm:$0xff] }
 0x255   : > { %v4473_v41 = vpop.eup %4472  ;;  %v872_v42 = vadd.f32 2.0, %v848_v29  ;;  %v838_v43 = vadd.f32 2.0, %v4471_v39  ;;  %4484 = vpow2.f32 %v825_v25  ;;  %3925 = vmatpush3.bf16.msra.mxu0 %v3922_v7  ;;  %v829_v62 = vmul.f32 1.442695, %v807_v50 }
 0x256   : > { %v871_v44 = vadd.f32 2.0, %v5583_v40  ;;  %v837_v45 = vadd.f32 2.0, %v4473_v41  ;;  %3927 = vmatprep.subr.bf16.mxu0 %v3926_v28  ;;  %v3938_v25 = vpack.c.bf16 %v1076_v6, %v1075_v5  ;;  %v5625_v52 = vpack.c.bf16 %v1370_v36, %v1369_v15 }
 0x257   : > { %4486 = vrcp.f32 %v872_v42  ;;  %v5586_v49 = vmul.f32 %v4471_v39, %v838_v43 }
 0x258   : > { %v4475_v54 = vpop.eup %4474  ;;  %4488 = vrcp.f32 %v871_v44  ;;  %v5589_v55 = vmul.f32 %v4473_v41, %v837_v45 }
 0x259   : > { %v4477_v56 = vpop.eup %4476  ;;  %v874_v57 = vadd.f32 2.0, %v5586_v49  ;;  %v840_v58 = vadd.f32 2.0, %v4475_v54  ;;  %4490 = vpow2.f32 %v831_v46  ;;  %3929 = vmatpush3.bf16.msra.mxu0 %v3926_v28  ;;  %v860_v28 = vmul.f32 %v848_v29, %v5532_v13 }
 0x25a   : > { %v873_v59 = vadd.f32 2.0, %v5589_v55  ;;  %v839_v60 = vadd.f32 2.0, %v4477_v56  ;;  %3931 = vmatprep.subr.bf16.mxu0 %v3930_v47  ;;  %v859_v13 = vmul.f32 %v5583_v40, %v5537_v19 }
 0x25b   : > { %4492 = vrcp.f32 %v874_v57  ;;  %v5593_v63 = vmul.f32 %v4475_v54, %v840_v58  ;;  %v998_v1 = vpop.f32.mrb[18].mxu0  ;;  %v862_v57 = vmul.f32 %v5586_v49, %v5543_v30 }
 0x25c   : > { %v4479_v7 = vpop.eup %4478  ;;  %4494 = vrcp.f32 %v873_v59  ;;  %v5597_v10 = vmul.f32 %v4477_v56, %v839_v60  ;;  %v5600_v11 = vadd.f32 %v5514_v34, %v998_v1  ;;  %v3341_v12 = vpop.f32.mrb[19].mxu0  ;;  %v861_v1 = vmul.f32 %v5589_v55, %v5548_v37  ;;  %v1703_v37 = vld [vmem:[#allocation12 + $0x210] sm:$0xff]  ;;  %v1704_v55 = vld [vmem:[#allocation12 + $0x218] sm:$0xff] }
 0x25d   : > { %v4481_v14 = vpop.eup %4480  ;;  %v876_v21 = vadd.f32 2.0, %v5593_v63  ;;  %v842_v22 = vadd.f32 2.0, %v4479_v7  ;;  %4496 = vpow2.f32 %v829_v62  ;;  %3933 = vmatpush3.bf16.msra.mxu0 %v3930_v47 }
 0x25e   : > { %v4483_v23 = vpop.eup %4482  ;;  %v894_v24 = vmul.f32 %v4481_v14, %v858_v9  ;;  %v875_v0 = vadd.f32 2.0, %v5597_v10  ;;  %v1012_v8 = vmin.f32 %v5600_v11, 20.0  ;;  %3935 = vmatprep.subr.bf16.mxu0 %v3934_v17 }
 0x25f   : > { %v4485_v26 = vpop.eup %4484  ;;  %v893_v27 = vmul.f32 %v4483_v23, %v857_v18  ;;  %4498 = vrcp.f32 %v876_v21  ;;  %v5608_v31 = vmul.f32 %v4479_v7, %v842_v22  ;;  %v1003_v4 = vpop.f32.mrb[20].mxu0  ;;  %v864_v18 = vmul.f32 %v5593_v63, %v5554_v48 }
 0x260   : > { %v5611_v38 = vmul.f32 %v894_v24, %v5534_v16  ;;  %4500 = vrcp.f32 %v875_v0  ;;  %v841_v39 = vadd.f32 2.0, %v4485_v26  ;;  %v1015_v41 = vmul.f32 1.442695, %v1012_v8  ;;  %v3344_v42 = vpop.f32.mrb[21].mxu0 }
 0x261   : > { %v4487_v43 = vpop.eup %4486  ;;  %v5614_v44 = vmul.f32 %v893_v27, %v5523_v3  ;;  %v878_v29 = vadd.f32 2.0, %v5608_v31  ;;  %3937 = vmatpush3.bf16.msra.mxu0 %v3934_v17  ;;  %v5620_v45 = vadd.f32 %v5514_v34, %v1003_v4  ;;  %v863_v0 = vmul.f32 %v5597_v10, %v5557_v51  ;;  %v1705_v51 = vld [vmem:[#allocation12 + $0x220] sm:$0xff]  ;;  %v1706_v10 = vld [vmem:[#allocation12 + $0x228] sm:$0xff] }
 0x262   : > { %v4489_v46 = vpop.eup %4488  ;;  %918 = vst [vmem:[#allocation2 + $0x28] sm:$0xff] %v5611_v38  ;;  %v896_v47 = vmul.f32 %v4487_v43, %v860_v28  ;;  %v5623_v50 = vmul.f32 %v4485_v26, %v841_v39  ;;  %4502 = vpow2.f32 %v1015_v41  ;;  %3939 = vmatprep.subr.bf16.mxu0 %v3938_v25  ;;  %v4010_v28 = vpack.c.bf16 %v1704_v55, %v1703_v37  ;;  %v1371_v37 = vld [vmem:[#allocation12 + $0x110] sm:$0xff]  ;;  %v1372_v55 = vld [vmem:[#allocation12 + $0x118] sm:$0xff] }
 0x263   : > { %v4491_v53 = vpop.eup %4490  ;;  %917 = vst [vmem:[#allocation2 + $0x20] sm:$0xff] %v5614_v44  ;;  %v895_v19 = vmul.f32 %v4489_v46, %v859_v13  ;;  %4504 = vrcp.f32 %v878_v29  ;;  %3384 = vmatmul.mubr.f32.gmra.mrb[26].mxu0 %v5614_v44  ;;  %v1013_v40 = vmin.f32 %v5620_v45, 20.0  ;;  %v1008_v54 = vpop.f32.mrb[22].mxu0  ;;  %v866_v39 = vmul.f32 %v5608_v31, %v5563_v61 }
 0x264   : > { %v5631_v56 = vmul.f32 %v896_v47, %v5523_v3  ;;  %v877_v58 = vadd.f32 2.0, %v5623_v50  ;;  %v844_v59 = vadd.f32 2.0, %v4491_v53  ;;  %3386 = vmatprep.mubr.f32.mxu0 %v5611_v38  ;;  %v3347_v60 = vpop.f32.mrb[23].mxu0  ;;  %v5643_v6 = vadd.f32 %v5514_v34, %v1008_v54 }
 0x265   : > { %v4493_v62 = vpop.eup %4492  ;;  %v5638_v17 = vmul.f32 %v895_v19, %v5545_v35  ;;  %v1017_v5 = vmul.f32 1.442695, %v1013_v40  ;;  %3941 = vmatpush3.bf16.msra.mxu0 %v3938_v25  ;;  %v4014_v31 = vpack.c.bf16 %v1706_v10, %v1705_v51  ;;  %v865_v47 = vmul.f32 %v5623_v50, %v5566_v2  ;;  %v1708_v19 = vld [vmem:[#allocation12 + $0x238] sm:$0xff] }
 0x266   : > { %v4495_v7 = vpop.eup %4494  ;;  %920 = vst [vmem:[#allocation2 + $0x38] sm:$0xff] %v5631_v56  ;;  %v898_v30 = vmul.f32 %v4493_v62, %v862_v57  ;;  %4506 = vrcp.f32 %v877_v58  ;;  %v5646_v49 = vmul.f32 %v4491_v53, %v844_v59  ;;  %3943 = vmatprep.subr.bf16.mxu0 %v5625_v52  ;;  %v1014_v34 = vmin.f32 %v5643_v6, 20.0  ;;  %v1050_v10 = vld [vmem:[#allocation2 + $0xf] sm:$0xff] }
 0x267   : > { %v4497_v9 = vpop.eup %4496  ;;  %919 = vst [vmem:[#allocation2 + $0x30] sm:$0xff] %v5638_v17  ;;  %v897_v12 = vmul.f32 %v4495_v7, %v861_v1  ;;  %3387 = vmatmul.mubr.f32.gmra.mrb[28].mxu0 %v5638_v17  ;;  %4508 = vpow2.f32 %v1017_v5  ;;  %v1709_v7 = vld [vmem:[#allocation12 + $0x240] sm:$0xff] }
 0x268   : > { %v5653_v14 = vmul.f32 %v898_v30, %v5545_v35  ;;  %v880_v21 = vadd.f32 2.0, %v5646_v49  ;;  %v843_v22 = vadd.f32 2.0, %v4497_v9  ;;  %3389 = vmatprep.mubr.f32.mxu0 %v5631_v56  ;;  %v1019_v8 = vmul.f32 1.442695, %v1014_v34  ;;  %v1710_v30 = vld [vmem:[#allocation12 + $0x248] sm:$0xff] }
 0x269   : > { %v4499_v23 = vpop.eup %4498  ;;  %v5660_v24 = vmul.f32 %v897_v12, %v5534_v16  ;;  %v868_v5 = vmul.f32 %v5646_v49, %v5575_v20  ;;  %v1049_v20 = vld [vmem:[#allocation2 + $0x7] sm:$0xff] }
 0x26a   : > { %v4501_v25 = vpop.eup %4500  ;;  %922 = vst [vmem:[#allocation2 + $0x48] sm:$0xff] %v5653_v14  ;;  %v900_v26 = vmul.f32 %v4499_v23, %v864_v18  ;;  %4510 = vrcp.f32 %v880_v21  ;;  %v5665_v27 = vmul.f32 %v4497_v9, %v843_v22  ;;  %v5667_v48 = vld [vmem:[#allocation2 + $0x1f] sm:$0xff]  ;;  %v5669_v63 = vld [vmem:[#allocation2 + $0x27] sm:$0xff]  ;;  %v4022_v23 = vpack.c.bf16 %v1710_v30, %v1709_v7  ;;  %v1376_v30 = vld [vmem:[#allocation12 + $0x138] sm:$0xff] }
 0x26b   : > { %921 = vst [vmem:[#allocation2 + $0x40] sm:$0xff] %v5660_v24  ;;  %v899_v4 = vmul.f32 %v4501_v25, %v863_v0  ;;  %3530 = vmatprep.mubr.f32.mxu1 %v5667_v48  ;;  %3390 = vmatmul.mubr.f32.gmra.mrb[30].mxu0 %v5660_v24  ;;  %4512 = vpow2.f32 %v1019_v8  ;;  %v1375_v7 = vld [vmem:[#allocation12 + $0x130] sm:$0xff] }
 0x26c   : > { %v4503_v15 = vpop.eup %4502  ;;  %v5675_v36 = vmul.f32 %v900_v26, %v5534_v16  ;;  %v879_v41 = vadd.f32 2.0, %v5665_v27  ;;  %3531 = vmatmul.mubr.f32.vlgmr.msra.gmra.mrb[0].mxu1 %v5669_v63  ;;  %3392 = vmatprep.mubr.f32.mxu0 %v5653_v14  ;;  %v867_v25 = vmul.f32 %v5665_v27, %v5581_v32  ;;  %v1711_v26 = vld [vmem:[#allocation12 + $0x250] sm:$0xff] }
 0x26d   : > { %v4505_v42 = vpop.eup %4504  ;;  %v5683_v43 = vmul.f32 %v899_v4, %v5523_v3  ;;  %v1021_v13 = vadd.f32 2.0, %v4503_v15  ;;  %4009 = vmatpush3.bf16.msra.mxu1 %v5508_v33  ;;  %v1707_v33 = vld [vmem:[#allocation12 + $0x230] sm:$0xff]  ;;  %v3946_v4 = vpack.c.bf16 %v1372_v55, %v1371_v37 }
 0x26e   : > { %924 = vst [vmem:[#allocation2 + $0x58] sm:$0xff] %v5675_v36  ;;  %v902_v29 = vmul.f32 %v4505_v42, %v866_v39  ;;  %4514 = vrcp.f32 %v879_v41  ;;  %v5687_v46 = vld [vmem:[#allocation2 + $0x2f] sm:$0xff]  ;;  %4011 = vmatprep.subr.bf16.mxu1 %v4010_v28  ;;  %v5689_v61 = vld [vmem:[#allocation2 + $0x37] sm:$0xff]  ;;  %v4018_v60 = vpack.c.bf16 %v1708_v19, %v1707_v33  ;;  %v1714_v33 = vld [vmem:[#allocation12 + $0x268] sm:$0xff] }
 0x26f   : > { %923 = vst [vmem:[#allocation2 + $0x50] sm:$0xff] %v5683_v43  ;;  %v1024_v53 = vmul.f32 %v4503_v15, %v1021_v13  ;;  %3533 = vmatprep.mubr.f32.mxu1 %v5687_v46  ;;  %3393 = vmatmul.mubr.f32.gmra.mrb[32].mxu0 %v5683_v43  ;;  %v1051_v41 = vld [vmem:[#allocation2 + $0x17] sm:$0xff]  ;;  %v1374_v13 = vld [vmem:[#allocation12 + $0x128] sm:$0xff] }
 0x270   : > { %v4507_v40 = vpop.eup %4506  ;;  %v5697_v54 = vmul.f32 %v902_v29, %v5523_v3  ;;  %3534 = vmatmul.mubr.f32.gmra.mrb[2].mxu1 %v5689_v61  ;;  %3395 = vmatprep.mubr.f32.mxu0 %v5675_v36  ;;  %v1373_v42 = vld [vmem:[#allocation12 + $0x120] sm:$0xff] }
 0x271   : > { %v4509_v57 = vpop.eup %4508  ;;  %v901_v58 = vmul.f32 %v4507_v40, %v865_v47  ;;  %v1030_v59 = vadd.f32 2.0, %v1024_v53  ;;  %4013 = vmatpush3.bf16.msra.mxu1 %v4010_v28  ;;  %v1712_v28 = vld [vmem:[#allocation12 + $0x258] sm:$0xff]  ;;  %v1027_v32 = vmul.f32 %v1024_v53, %v5600_v11  ;;  %v1713_v47 = vld [vmem:[#allocation12 + $0x260] sm:$0xff] }
 0x272   : > { %926 = vst [vmem:[#allocation2 + $0x68] sm:$0xff] %v5697_v54  ;;  %v5702_v2 = vld [vmem:[#allocation2 + $0x3f] sm:$0xff]  ;;  %4015 = vmatprep.subr.bf16.mxu1 %v4014_v31  ;;  %v5704_v50 = vld [vmem:[#allocation2 + $0x47] sm:$0xff]  ;;  %v1022_v62 = vadd.f32 2.0, %v4509_v57  ;;  %v4026_v27 = vpack.c.bf16 %v1712_v28, %v1711_v26  ;;  %v1870_v28 = vld [vmem:[#allocation12 + $0x298] sm:$0xff] }
 0x273   : > { %v5707_v1 = vmul.f32 %v901_v58, %v5545_v35  ;;  %4516 = vrcp.f32 %v1030_v59  ;;  %3536 = vmatprep.mubr.f32.mxu1 %v5702_v2  ;;  %v1042_v58 = vstv %s533_s2  ;;  %v1869_v26 = vld [vmem:[#allocation12 + $0x290] sm:$0xff] }
 0x274   : > { %v4511_v9 = vpop.eup %4510  ;;  %3537 = vmatmul.mubr.f32.gmra.mrb[4].mxu1 %v5704_v50  ;;  %v1025_v12 = vmul.f32 %v4509_v57, %v1022_v62  ;;  %v4030_v57 = vpack.c.bf16 %v1714_v33, %v1713_v47  ;;  %v1716_v62 = vld [vmem:[#allocation12 + $0x278] sm:$0xff] }
 0x275   : > { %v4513_v34 = vpop.eup %4512  ;;  %925 = vst [vmem:[#allocation2 + $0x60] sm:$0xff] %v5707_v1  ;;  %v904_v18 = vmul.f32 %v4511_v9, %v868_v5  ;;  %4017 = vmatpush3.bf16.msra.mxu1 %v4014_v31  ;;  %3396 = vmatmul.mubr.f32.gmra.mrb[34].mxu0 %v5707_v1  ;;  %v1874_v47 = vld [vmem:[#allocation12 + $0x2b8] sm:$0xff] }
 0x276   : > { %v5716_v49 = vld [vmem:[#allocation2 + $0x4f] sm:$0xff]  ;;  %4019 = vmatprep.subr.bf16.mxu1 %v4018_v60  ;;  %v5718_v21 = vld [vmem:[#allocation2 + $0x57] sm:$0xff]  ;;  %v1031_v22 = vadd.f32 2.0, %v1025_v12  ;;  %3430 = vmatprep.mubr.f32.mxu0 %v1049_v20  ;;  %v1023_v0 = vadd.f32 2.0, %v4513_v34  ;;  %v1028_v59 = vmul.f32 %v1025_v12, %v5620_v45  ;;  %v3954_v45 = vpack.c.bf16 %v1376_v30, %v1375_v7  ;;  %v1868_v12 = vld [vmem:[#allocation12 + $0x288] sm:$0xff] }
 0x277   : > { %v5721_v8 = vmul.f32 %v904_v18, %v5545_v35  ;;  %3539 = vmatprep.mubr.f32.mxu1 %v5716_v49  ;;  %v1377_v18 = vld [vmem:[#allocation12 + $0x140] sm:$0xff]  ;;  %v1384_v33 = vld [vmem:[#allocation12 + $0x178] sm:$0xff] }
 0x278   : > { %v4515_v51 = vpop.eup %4514  ;;  %3540 = vmatmul.mubr.f32.gmra.mrb[6].mxu1 %v5718_v21  ;;  %4518 = vrcp.f32 %v1031_v22  ;;  %v1026_v15 = vmul.f32 %v4513_v34, %v1023_v0  ;;  %v1378_v22 = vld [vmem:[#allocation12 + $0x148] sm:$0xff]  ;;  %v1882_v7 = vld [vmem:[#allocation12 + $0x2f8] sm:$0xff] }
 0x279   : > { %928 = vst [vmem:[#allocation2 + $0x78] sm:$0xff] %v5721_v8  ;;  %v903_v39 = vmul.f32 %v4515_v51, %v867_v25  ;;  %4021 = vmatpush3.bf16.msra.mxu1 %v4018_v60  ;;  %3431 = vmatmul.mubr.f32.vlgmr.msra.gmra.mrb[24].mxu0 %v1050_v10  ;;  %v1715_v60 = vld [vmem:[#allocation12 + $0x270] sm:$0xff]  ;;  %v3958_v25 = vpack.c.bf16 %v1378_v22, %v1377_v18  ;;  %v1380_v51 = vld [vmem:[#allocation12 + $0x158] sm:$0xff]  ;;  %v2037_v22 = vld [vmem:[#allocation12 + $0x320] sm:$0xff] }
 0x27a   : > { %4023 = vmatprep.subr.bf16.mxu1 %v4022_v23  ;;  %3945 = vmatpush3.bf16.msra.mxu0 %v5625_v52  ;;  %v1032_v29 = vadd.f32 2.0, %v1026_v15  ;;  %v3950_v52 = vpack.c.bf16 %v1374_v13, %v1373_v42  ;;  %v4034_v55 = vpack.c.bf16 %v1716_v62, %v1715_v60  ;;  %v1382_v42 = vld [vmem:[#allocation12 + $0x168] sm:$0xff]  ;;  %v1879_v60 = vld [vmem:[#allocation12 + $0x2e0] sm:$0xff]  ;;  %v1360_v30 = vld [vmem:[#allocation2 + $0x29] sm:$0xff] }
 0x27b   : > { %v5735_v31 = vmul.f32 %v903_v39, %v5534_v16  ;;  %3433 = vmatprep.mubr.f32.mxu0 %v1051_v41  ;;  %3947 = vmatprep.subr.bf16.mxu0 %v3946_v4  ;;  %v1871_v39 = vld [vmem:[#allocation12 + $0x2a0] sm:$0xff]  ;;  %v1880_v62 = vld [vmem:[#allocation12 + $0x2e8] sm:$0xff]  ;;  %v5792_v18 = vld [vmem:[#allocation2 + $0x49] sm:$0xff] }
 0x27c   : > { %v5738_v19 = vld [vmem:[#allocation2 + $0x5f] sm:$0xff]  ;;  %v5740_v40 = vld [vmem:[#allocation2 + $0x67] sm:$0xff]  ;;  %4520 = vrcp.f32 %v1032_v29 }
 0x27d   : > { %v4517_v11 = vpop.eup %4516  ;;  %927 = vst [vmem:[#allocation2 + $0x70] sm:$0xff] %v5735_v31  ;;  %3542 = vmatprep.mubr.f32.mxu1 %v5738_v19  ;;  %4025 = vmatpush3.bf16.msra.mxu1 %v4022_v23  ;;  %v1381_v41 = vld [vmem:[#allocation12 + $0x160] sm:$0xff]  ;;  %v1873_v29 = vld [vmem:[#allocation12 + $0x2b0] sm:$0xff] }
 0x27e   : > { %v1036_v53 = vmul.f32 %v4517_v11, %v1027_v32  ;;  %3543 = vmatmul.mubr.f32.gmra.mrb[8].mxu1 %v5740_v40  ;;  %4027 = vmatprep.subr.bf16.mxu1 %v4026_v27  ;;  %v1872_v32 = vld [vmem:[#allocation12 + $0x2a8] sm:$0xff]  ;;  %v3966_v13 = vpack.c.bf16 %v1382_v42, %v1381_v41  ;;  %v4050_v11 = vpack.c.bf16 %v1874_v47, %v1873_v29  ;;  %v2045_v42 = vld [vmem:[#allocation12 + $0x360] sm:$0xff] }
 0x27f   : > { %3434 = vmatmul.mubr.f32.gmra.mrb[26].mxu0 %v5667_v48  ;;  %v1867_v48 = vld [vmem:[#allocation12 + $0x280] sm:$0xff] }
 0x280   : > { %v1039_v5 = vmul.f32 %v1036_v53, %v5523_v3  ;;  %3949 = vmatpush3.bf16.msra.mxu0 %v3946_v4  ;;  %3436 = vmatprep.mubr.f32.mxu0 %v5669_v63  ;;  %v1029_v3 = vmul.f32 %v1026_v15, %v5643_v6  ;;  %v4038_v6 = vpack.c.bf16 %v1868_v12, %v1867_v48  ;;  %v1875_v53 = vld [vmem:[#allocation12 + $0x2c0] sm:$0xff]  ;;  %v2036_v48 = vld [vmem:[#allocation12 + $0x318] sm:$0xff]  ;;  %v5789_v12 = vld [vmem:[#allocation2 + $0x41] sm:$0xff] }
 0x281   : > { %4029 = vmatpush3.bf16.msra.mxu1 %v4026_v27  ;;  %3951 = vmatprep.subr.bf16.mxu0 %v3950_v52  ;;  %v4042_v15 = vpack.c.bf16 %v1870_v28, %v1869_v26  ;;  %v2039_v26 = vld [vmem:[#allocation12 + $0x330] sm:$0xff]  ;;  %v2040_v28 = vld [vmem:[#allocation12 + $0x338] sm:$0xff] }
 0x282   : > { %v4519_v9 = vpop.eup %4518  ;;  %v5749_v37 = vmul.f32 %v1042_v58, %v1039_v5  ;;  %4031 = vmatprep.subr.bf16.mxu1 %v4030_v57  ;;  %v4062_v5 = vpack.c.bf16 %v1880_v62, %v1879_v60  ;;  %v2205_v60 = vld [vmem:[#allocation12 + $0x3b0] sm:$0xff]  ;;  %v2206_v62 = vld [vmem:[#allocation12 + $0x3b8] sm:$0xff] }
 0x283   : > { %v1037_v34 = vmul.f32 %v4519_v9, %v1028_v59  ;;  %3437 = vmatmul.mubr.f32.gmra.mrb[28].mxu0 %v5687_v46  ;;  %v2034_v9 = vld [vmem:[#allocation12 + $0x308] sm:$0xff] }
 0x284   : > { %1046 = vst [vmem:[#allocation2 + $0x80] sm:$0xff] %v5749_v37  ;;  %v5754_v63 = vld [vmem:[#allocation2 + $0x6f] sm:$0xff]  ;;  %v5756_v20 = vld [vmem:[#allocation2 + $0x77] sm:$0xff]  ;;  %3953 = vmatpush3.bf16.msra.mxu0 %v3950_v52  ;;  %3439 = vmatprep.mubr.f32.mxu0 %v5689_v61 }
 0x285   : > { %v1040_v23 = vmul.f32 %v1037_v34, %v5534_v16  ;;  %3545 = vmatprep.mubr.f32.mxu1 %v5754_v63  ;;  %4033 = vmatpush3.bf16.msra.mxu1 %v4030_v57  ;;  %v1379_v16 = vld [vmem:[#allocation12 + $0x150] sm:$0xff]  ;;  %v1876_v57 = vld [vmem:[#allocation12 + $0x2c8] sm:$0xff] }
 0x286   : > { %v4521_v46 = vpop.eup %4520  ;;  %3546 = vmatmul.mubr.f32.gmra.mrb[10].mxu1 %v5756_v20  ;;  %4035 = vmatprep.subr.bf16.mxu1 %v4034_v55  ;;  %v5786_v34 = vld [vmem:[#allocation2 + $0x39] sm:$0xff]  ;;  %v5810_v41 = vld [vmem:[#allocation2 + $0x69] sm:$0xff] }
 0x287   : > { %v5762_v0 = vmul.f32 %v1042_v58, %v1040_v23  ;;  %3580 = vmatprep.mubr.f32.mxu1 %v5614_v44  ;;  %3955 = vmatprep.subr.bf16.mxu0 %v3954_v45  ;;  %v1038_v4 = vmul.f32 %v4521_v46, %v1029_v3  ;;  %v3962_v44 = vpack.c.bf16 %v1380_v51, %v1379_v16  ;;  %v2038_v23 = vld [vmem:[#allocation12 + $0x328] sm:$0xff]  ;;  %v5795_v46 = vld [vmem:[#allocation2 + $0x51] sm:$0xff] }
 0x288   : > { %3440 = vmatmul.mubr.f32.gmra.mrb[30].mxu0 %v5702_v2  ;;  %v4082_v16 = vpack.c.bf16 %v2040_v28, %v2039_v26  ;;  %v2041_v51 = vld [vmem:[#allocation12 + $0x340] sm:$0xff]  ;;  %v2188_v26 = vld [vmem:[#allocation2 + $0x48] sm:$0xff] }
 0x289   : > { %1047 = vst [vmem:[#allocation2 + $0x88] sm:$0xff] %v5762_v0  ;;  %4037 = vmatpush3.bf16.msra.mxu1 %v4034_v55  ;;  %3957 = vmatpush3.bf16.msra.mxu0 %v3954_v45  ;;  %v1041_v10 = vmul.f32 %v1038_v4, %v5545_v35  ;;  %v4046_v35 = vpack.c.bf16 %v1872_v32, %v1871_v39  ;;  %v1361_v55 = vld [vmem:[#allocation2 + $0x31] sm:$0xff]  ;;  %v5803_v4 = vld [vmem:[#allocation2 + $0x61] sm:$0xff] }
 0x28a   : > { %4039 = vmatprep.subr.bf16.mxu1 %v4038_v6  ;;  %3442 = vmatprep.mubr.f32.mxu0 %v5704_v50  ;;  %v2044_v39 = vld [vmem:[#allocation12 + $0x358] sm:$0xff] }
 0x28b   : > { %3959 = vmatprep.subr.bf16.mxu0 %v3958_v25  ;;  %v5769_v27 = vmul.f32 %v1042_v58, %v1041_v10  ;;  %v1878_v58 = vld [vmem:[#allocation12 + $0x2d8] sm:$0xff]  ;;  %v2042_v10 = vld [vmem:[#allocation12 + $0x348] sm:$0xff] }
 0x28c   : > { %3581 = vmatmul.mubr.f32.vlgmr.msra.gmra.mrb[0].mxu1 %v5611_v38  ;;  %3443 = vmatmul.mubr.f32.gmra.mrb[32].mxu0 %v5716_v49  ;;  %v1383_v38 = vld [vmem:[#allocation12 + $0x170] sm:$0xff]  ;;  %v5816_v47 = vld [vmem:[#allocation2 + $0x79] sm:$0xff] }
 0x28d   : > { %3583 = vmatprep.mubr.f32.mxu1 %v5638_v17  ;;  %4041 = vmatpush3.bf16.msra.mxu1 %v4038_v6  ;;  %1048 = vst [vmem:[#allocation2 + $0x90] sm:$0xff] %v5769_v27  ;;  %v1356_v17 = vld [vmem:[#allocation2 + $0x9] sm:$0xff]  ;;  %v3970_v52 = vpack.c.bf16 %v1384_v33, %v1383_v38  ;;  %v5798_v6 = vld [vmem:[#allocation2 + $0x59] sm:$0xff] }
 0x28e   : > { %3961 = vmatpush3.bf16.msra.mxu0 %v3958_v25  ;;  %4043 = vmatprep.subr.bf16.mxu1 %v4042_v15  ;;  %v4078_v25 = vpack.c.bf16 %v2038_v23, %v2037_v22  ;;  %v2047_v38 = vld [vmem:[#allocation12 + $0x370] sm:$0xff]  ;;  %v2048_v33 = vld [vmem:[#allocation12 + $0x378] sm:$0xff]  ;;  %v2187_v22 = vld [vmem:[#allocation2 + $0x40] sm:$0xff] }
 0x28f   : > { %3445 = vmatprep.mubr.f32.mxu0 %v5718_v21  ;;  %3963 = vmatprep.subr.bf16.mxu0 %v3962_v44  ;;  %v2369_v23 = vld [vmem:[#allocation12 + $0x420] sm:$0xff] }
 0x290   : > { %3584 = vmatmul.mubr.f32.gmra.mrb[2].mxu1 %v5631_v56  ;;  %3446 = vmatmul.mubr.f32.gmra.mrb[34].mxu0 %v5738_v19  ;;  %v4054_v56 = vpack.c.bf16 %v1876_v57, %v1875_v53  ;;  %v2201_v57 = vld [vmem:[#allocation12 + $0x390] sm:$0xff] }
 0x291   : > { %3586 = vmatprep.mubr.f32.mxu1 %v5660_v24  ;;  %4045 = vmatpush3.bf16.msra.mxu1 %v4042_v15  ;;  %v1877_v24 = vld [vmem:[#allocation12 + $0x2d0] sm:$0xff]  ;;  %v4086_v15 = vpack.c.bf16 %v2042_v10, %v2041_v51  ;;  %v2372_v10 = vld [vmem:[#allocation12 + $0x438] sm:$0xff] }
 0x292   : > { %3965 = vmatpush3.bf16.msra.mxu0 %v3962_v44  ;;  %4047 = vmatprep.subr.bf16.mxu1 %v4046_v35  ;;  %v4058_v59 = vpack.c.bf16 %v1878_v58, %v1877_v24  ;;  %v2043_v44 = vld [vmem:[#allocation12 + $0x350] sm:$0xff]  ;;  %v2203_v58 = vld [vmem:[#allocation12 + $0x3a0] sm:$0xff] }
 0x293   : > { %3480 = vmatprep.mubr.f32.mxu0 %v1356_v17  ;;  %3967 = vmatprep.subr.bf16.mxu0 %v3966_v13  ;;  %v4090_v32 = vpack.c.bf16 %v2044_v39, %v2043_v44  ;;  %v4098_v17 = vpack.c.bf16 %v2048_v33, %v2047_v38  ;;  %v2371_v51 = vld [vmem:[#allocation12 + $0x430] sm:$0xff]  ;;  %v2191_v39 = vld [vmem:[#allocation2 + $0x60] sm:$0xff]  ;;  %v2193_v38 = vld [vmem:[#allocation2 + $0x70] sm:$0xff] }
 0x294   : > { %3587 = vmatmul.mubr.f32.gmra.mrb[4].mxu1 %v5653_v14  ;;  %v1357_v14 = vld [vmem:[#allocation2 + $0x11] sm:$0xff]  ;;  %v4146_v44 = vpack.c.bf16 %v2372_v10, %v2371_v51  ;;  %v2375_v33 = vld [vmem:[#allocation12 + $0x450] sm:$0xff] }
 0x295   : > { %3589 = vmatprep.mubr.f32.mxu1 %v5683_v43  ;;  %4049 = vmatpush3.bf16.msra.mxu1 %v4046_v35  ;;  %v1358_v43 = vld [vmem:[#allocation2 + $0x19] sm:$0xff] }
 0x296   : > { %3969 = vmatpush3.bf16.msra.mxu0 %v3966_v13  ;;  %4051 = vmatprep.subr.bf16.mxu1 %v4050_v11  ;;  %v2046_v35 = vld [vmem:[#allocation12 + $0x368] sm:$0xff]  ;;  %v5813_v13 = vld [vmem:[#allocation2 + $0x71] sm:$0xff] }
 0x297   : > { %3971 = vmatprep.subr.bf16.mxu0 %v3970_v52  ;;  %v4094_v29 = vpack.c.bf16 %v2046_v35, %v2045_v42  ;;  %v2374_v42 = vld [vmem:[#allocation12 + $0x448] sm:$0xff]  ;;  %v2192_v35 = vld [vmem:[#allocation2 + $0x68] sm:$0xff] }
 0x298   : > { %3590 = vmatmul.mubr.f32.gmra.mrb[6].mxu1 %v5675_v36  ;;  %v1881_v36 = vld [vmem:[#allocation12 + $0x2f0] sm:$0xff] }
 0x299   : > { %3592 = vmatprep.mubr.f32.mxu1 %v5707_v1  ;;  %4053 = vmatpush3.bf16.msra.mxu1 %v4050_v11  ;;  %v1854_v1 = vld [vmem:[#allocation2 + $0x21] sm:$0xff]  ;;  %v2199_v11 = vld [vmem:[#allocation12 + $0x380] sm:$0xff] }
 0x29a   : > { %3973 = vmatpush3.bf16.msra.mxu0 %v3970_v52  ;;  %4055 = vmatprep.subr.bf16.mxu1 %v4054_v56  ;;  %v2200_v52 = vld [vmem:[#allocation12 + $0x388] sm:$0xff] }
 0x29b   : > { %v4102_v53 = vpack.c.bf16 %v2200_v52, %v2199_v11  ;;  %v2194_v11 = vld [vmem:[#allocation2 + $0x78] sm:$0xff] }
 0x29c   : > { %3593 = vmatmul.mubr.f32.gmra.mrb[8].mxu1 %v5697_v54  ;;  %v4066_v54 = vpack.c.bf16 %v1882_v7, %v1881_v36  ;;  %v2210_v36 = vld [vmem:[#allocation12 + $0x3d8] sm:$0xff]  ;;  %v2211_v7 = vld [vmem:[#allocation12 + $0x3e0] sm:$0xff] }
 0x29d   : > { %3595 = vmatprep.mubr.f32.mxu1 %v5735_v31  ;;  %4057 = vmatpush3.bf16.msra.mxu1 %v4054_v56  ;;  %v2033_v31 = vld [vmem:[#allocation12 + $0x300] sm:$0xff]  ;;  %v2202_v56 = vld [vmem:[#allocation12 + $0x398] sm:$0xff] }
 0x29e   : > { %3481 = vmatmul.mubr.f32.vlgmr.msra.gmra.mrb[24].mxu0 %v1357_v14  ;;  %4059 = vmatprep.subr.bf16.mxu1 %v4058_v59  ;;  %v4070_v45 = vpack.c.bf16 %v2034_v9, %v2033_v31  ;;  %v4106_v24 = vpack.c.bf16 %v2202_v56, %v2201_v57  ;;  %v4114_v14 = vpack.c.bf16 %v2206_v62, %v2205_v60  ;;  %v2214_v31 = vld [vmem:[#allocation12 + $0x3f8] sm:$0xff]  ;;  %v2186_v9 = vld [vmem:[#allocation2 + $0x38] sm:$0xff]  ;;  %v2378_v57 = vld [vmem:[#allocation12 + $0x468] sm:$0xff] }
 0x29f   : > { %3483 = vmatprep.mubr.f32.mxu0 %v1358_v43  ;;  %v2207_v43 = vld [vmem:[#allocation12 + $0x3c0] sm:$0xff] }
 0x2a0   : > { %3596 = vmatmul.mubr.f32.gmra.mrb[10].mxu1 %v5721_v8  ;;  %v2035_v8 = vld [vmem:[#allocation12 + $0x310] sm:$0xff] }
 0x2a1   : > { %4061 = vmatpush3.bf16.msra.mxu1 %v4058_v59  ;;  %3630 = vmatprep.mubr.f32.mxu1 %v1854_v1  ;;  %v4074_v3 = vpack.c.bf16 %v2036_v48, %v2035_v8  ;;  %v2204_v59 = vld [vmem:[#allocation12 + $0x3a8] sm:$0xff]  ;;  %v2367_v8 = vld [vmem:[#allocation12 + $0x410] sm:$0xff]  ;;  %v2368_v48 = vld [vmem:[#allocation12 + $0x418] sm:$0xff] }
 0x2a2   : > { %3484 = vmatmul.mubr.f32.gmra.mrb[26].mxu0 %v1854_v1  ;;  %4063 = vmatprep.subr.bf16.mxu1 %v4062_v5  ;;  %v2212_v1 = vld [vmem:[#allocation12 + $0x3e8] sm:$0xff] }
 0x2a3   : > { %3486 = vmatprep.mubr.f32.mxu0 %v1360_v30 }
 0x2a5   : > { %4065 = vmatpush3.bf16.msra.mxu1 %v4062_v5  ;;  %v2208_v5 = vld [vmem:[#allocation12 + $0x3c8] sm:$0xff] }
 0x2a6   : > { %3487 = vmatmul.mubr.f32.gmra.mrb[28].mxu0 %v1361_v55  ;;  %4067 = vmatprep.subr.bf16.mxu1 %v4066_v54 }
 0x2a7   : > { %3489 = vmatprep.mubr.f32.mxu0 %v5786_v34 }
 0x2a9   : > { %4069 = vmatpush3.bf16.msra.mxu1 %v4066_v54  ;;  %v2213_v54 = vld [vmem:[#allocation12 + $0x3f0] sm:$0xff] }
 0x2aa   : > { %3490 = vmatmul.mubr.f32.gmra.mrb[30].mxu0 %v5789_v12  ;;  %4071 = vmatprep.subr.bf16.mxu1 %v4070_v45 }
 0x2ab   : > { %3492 = vmatprep.mubr.f32.mxu0 %v5792_v18 }
 0x2ac   : > { %3631 = vmatmul.mubr.f32.vlgmr.msra.gmra.mrb[0].mxu1 %v1360_v30  ;;  %v2030_v30 = vld [vmem:[#allocation2 + $0x87] sm:$0xff] }
 0x2ad   : > { %3633 = vmatprep.mubr.f32.mxu1 %v1361_v55  ;;  %4073 = vmatpush3.bf16.msra.mxu1 %v4070_v45  ;;  %v2366_v55 = vld [vmem:[#allocation12 + $0x408] sm:$0xff] }
 0x2ae   : > { %3493 = vmatmul.mubr.f32.gmra.mrb[32].mxu0 %v5795_v46  ;;  %4075 = vmatprep.subr.bf16.mxu1 %v4074_v3 }
 0x2af   : > { %3495 = vmatprep.mubr.f32.mxu0 %v5798_v6 }
 0x2b0   : > { %3634 = vmatmul.mubr.f32.gmra.mrb[2].mxu1 %v5786_v34 }
 0x2b1   : > { %3636 = vmatprep.mubr.f32.mxu1 %v5789_v12  ;;  %4077 = vmatpush3.bf16.msra.mxu1 %v4074_v3  ;;  %v4138_v3 = vpack.c.bf16 %v2368_v48, %v2367_v8 }
 0x2b2   : > { %3496 = vmatmul.mubr.f32.gmra.mrb[34].mxu0 %v5803_v4  ;;  %4079 = vmatprep.subr.bf16.mxu1 %v4078_v25 }
 0x2b4   : > { %3637 = vmatmul.mubr.f32.gmra.mrb[4].mxu1 %v5792_v18 }
 0x2b5   : > { %3639 = vmatprep.mubr.f32.mxu1 %v5795_v46  ;;  %4081 = vmatpush3.bf16.msra.mxu1 %v4078_v25  ;;  %v2370_v25 = vld [vmem:[#allocation12 + $0x428] sm:$0xff] }
 0x2b6   : > { %4083 = vmatprep.subr.bf16.mxu1 %v4082_v16  ;;  %v4142_v28 = vpack.c.bf16 %v2370_v25, %v2369_v23 }
 0x2b8   : > { %3640 = vmatmul.mubr.f32.gmra.mrb[6].mxu1 %v5798_v6 }
 0x2b9   : > { %3642 = vmatprep.mubr.f32.mxu1 %v5803_v4  ;;  %4085 = vmatpush3.bf16.msra.mxu1 %v4082_v16  ;;  %v2189_v16 = vld [vmem:[#allocation2 + $0x50] sm:$0xff] }
 0x2ba   : > { %4087 = vmatprep.subr.bf16.mxu1 %v4086_v15 }
 0x2bc   : > { %3643 = vmatmul.mubr.f32.gmra.mrb[8].mxu1 %v5810_v41 }
 0x2bd   : > { %3645 = vmatprep.mubr.f32.mxu1 %v5813_v13  ;;  %4089 = vmatpush3.bf16.msra.mxu1 %v4086_v15  ;;  %v2190_v15 = vld [vmem:[#allocation2 + $0x58] sm:$0xff] }
 0x2be   : > { %4091 = vmatprep.subr.bf16.mxu1 %v4090_v32 }
 0x2c0   : > { %3646 = vmatmul.mubr.f32.gmra.mrb[10].mxu1 %v5816_v47 }
 0x2c1   : > { %4093 = vmatpush3.bf16.msra.mxu1 %v4090_v32  ;;  %3680 = vmatprep.mubr.f32.mxu1 %v5689_v61  ;;  %v4110_v61 = vpack.c.bf16 %v2204_v59, %v2203_v58  ;;  %v2373_v32 = vld [vmem:[#allocation12 + $0x440] sm:$0xff]  ;;  %v2380_v58 = vld [vmem:[#allocation12 + $0x478] sm:$0xff] }
 0x2c2   : > { %4095 = vmatprep.subr.bf16.mxu1 %v4094_v29 }
 0x2c5   : > { %4097 = vmatpush3.bf16.msra.mxu1 %v4094_v29  ;;  %v4150_v29 = vpack.c.bf16 %v2374_v42, %v2373_v32 }
 0x2c6   : > { %4099 = vmatprep.subr.bf16.mxu1 %v4098_v17 }
 0x2c9   : > { %4101 = vmatpush3.bf16.msra.mxu1 %v4098_v17  ;;  %v2376_v17 = vld [vmem:[#allocation12 + $0x458] sm:$0xff] }
 0x2ca   : > { %4103 = vmatprep.subr.bf16.mxu1 %v4102_v53  ;;  %v4154_v52 = vpack.c.bf16 %v2376_v17, %v2375_v33 }
 0x2cc   : > { %3681 = vmatmul.mubr.f32.vlgmr.msra.gmra.mrb[0].mxu1 %v5702_v2  ;;  %v4118_v2 = vpack.c.bf16 %v2208_v5, %v2207_v43  ;;  %v5845_v43 = vld [vmem:[%s6131_s17] ss:$0 sm:$0xff] }
 0x2cd   : > { %3683 = vmatprep.mubr.f32.mxu1 %v5704_v50  ;;  %4105 = vmatpush3.bf16.msra.mxu1 %v4102_v53  ;;  %v2209_v50 = vld [vmem:[#allocation12 + $0x3d0] sm:$0xff]  ;;  %v2377_v53 = vld [vmem:[#allocation12 + $0x460] sm:$0xff] }
 0x2ce   : > { %4107 = vmatprep.subr.bf16.mxu1 %v4106_v24  ;;  %v4158_v56 = vpack.c.bf16 %v2378_v57, %v2377_v53 }
 0x2d0   : > { %3684 = vmatmul.mubr.f32.gmra.mrb[2].mxu1 %v5716_v49  ;;  %v4122_v49 = vpack.c.bf16 %v2210_v36, %v2209_v50 }
 0x2d1   : > { %3686 = vmatprep.mubr.f32.mxu1 %v5718_v21  ;;  %4109 = vmatpush3.bf16.msra.mxu1 %v4106_v24  ;;  %v2029_v21 = vld [vmem:[#allocation2 + $0x7f] sm:$0xff]  ;;  %v2379_v24 = vld [vmem:[#allocation12 + $0x470] sm:$0xff] }
 0x2d2   : > { %4111 = vmatprep.subr.bf16.mxu1 %v4110_v61  ;;  %v4162_v59 = vpack.c.bf16 %v2380_v58, %v2379_v24 }
 0x2d4   : > { %3687 = vmatmul.mubr.f32.gmra.mrb[4].mxu1 %v5738_v19  ;;  %v4126_v19 = vpack.c.bf16 %v2212_v1, %v2211_v7 }
 0x2d5   : > { %3689 = vmatprep.mubr.f32.mxu1 %v5740_v40  ;;  %4113 = vmatpush3.bf16.msra.mxu1 %v4110_v61  ;;  %v2031_v40 = vld [vmem:[#allocation2 + $0x8f] sm:$0xff] }
 0x2d6   : > { %4115 = vmatprep.subr.bf16.mxu1 %v4114_v14 }
 0x2d8   : > { %3690 = vmatmul.mubr.f32.gmra.mrb[6].mxu1 %v5754_v63  ;;  %v4130_v63 = vpack.c.bf16 %v2214_v31, %v2213_v54 }
 0x2d9   : > { %3692 = vmatprep.mubr.f32.mxu1 %v5756_v20  ;;  %4117 = vmatpush3.bf16.msra.mxu1 %v4114_v14  ;;  %v2365_v20 = vld [vmem:[#allocation12 + $0x400] sm:$0xff] }
 0x2da   : > { %4119 = vmatprep.subr.bf16.mxu1 %v4118_v2  ;;  %v4134_v45 = vpack.c.bf16 %v2366_v55, %v2365_v20 }
 0x2dc   : > { %3693 = vmatmul.mubr.f32.gmra.mrb[8].mxu1 %v2029_v21 }
 0x2dd   : > { %3695 = vmatprep.mubr.f32.mxu1 %v2030_v30  ;;  %4121 = vmatpush3.bf16.msra.mxu1 %v4118_v2 }
 0x2de   : > { %4123 = vmatprep.subr.bf16.mxu1 %v4122_v49 }
 0x2e0   : > { %3696 = vmatmul.mubr.f32.gmra.mrb[10].mxu1 %v2031_v40 }
 0x2e1   : > { %4125 = vmatpush3.bf16.msra.mxu1 %v4122_v49  ;;  %3730 = vmatprep.mubr.f32.mxu1 %v2186_v9 }
 0x2e2   : > { %4127 = vmatprep.subr.bf16.mxu1 %v4126_v19 }
 0x2e5   : > { %4129 = vmatpush3.bf16.msra.mxu1 %v4126_v19 }
 0x2e6   : > { %4131 = vmatprep.subr.bf16.mxu1 %v4130_v63 }
 0x2e9   : > { %4133 = vmatpush3.bf16.msra.mxu1 %v4130_v63 }
 0x2ea   : > { %4135 = vmatprep.subr.bf16.mxu1 %v4134_v45 }
 0x2ec   : > { %3731 = vmatmul.mubr.f32.vlgmr.msra.gmra.mrb[0].mxu1 %v2187_v22 }
 0x2ed   : > { %3733 = vmatprep.mubr.f32.mxu1 %v2188_v26  ;;  %4137 = vmatpush3.bf16.msra.mxu1 %v4134_v45 }
 0x2ee   : > { %4139 = vmatprep.subr.bf16.mxu1 %v4138_v3 }
 0x2f0   : > { %3734 = vmatmul.mubr.f32.gmra.mrb[2].mxu1 %v2189_v16 }
 0x2f1   : > { %3736 = vmatprep.mubr.f32.mxu1 %v2190_v15  ;;  %4141 = vmatpush3.bf16.msra.mxu1 %v4138_v3 }
 0x2f2   : > { %4143 = vmatprep.subr.bf16.mxu1 %v4142_v28 }
 0x2f4   : > { %3737 = vmatmul.mubr.f32.gmra.mrb[4].mxu1 %v2191_v39 }
 0x2f5   : > { %3739 = vmatprep.mubr.f32.mxu1 %v2192_v35  ;;  %4145 = vmatpush3.bf16.msra.mxu1 %v4142_v28 }
 0x2f6   : > { %4147 = vmatprep.subr.bf16.mxu1 %v4146_v44 }
 0x2f8   : > { %3740 = vmatmul.mubr.f32.gmra.mrb[6].mxu1 %v2193_v38 }
 0x2f9   : > { %3742 = vmatprep.mubr.f32.mxu1 %v2194_v11  ;;  %4149 = vmatpush3.bf16.msra.mxu1 %v4146_v44 }
 0x2fa   : > { %4151 = vmatprep.subr.bf16.mxu1 %v4150_v29 }
 0x2fc   : > { %3743 = vmatmul.mubr.f32.gmra.mrb[8].mxu1 %v5749_v37  ;;  %v2361_v37 = vld [vmem:[#allocation2 + $0x81] sm:$0xff] }
 0x2fd   : > { %3745 = vmatprep.mubr.f32.mxu1 %v5762_v0  ;;  %4153 = vmatpush3.bf16.msra.mxu1 %v4150_v29  ;;  %v2362_v0 = vld [vmem:[#allocation2 + $0x89] sm:$0xff] }
 0x2fe   : > { %4155 = vmatprep.subr.bf16.mxu1 %v4154_v52 }
 0x300   : > { %3746 = vmatmul.mubr.f32.gmra.mrb[10].mxu1 %v5769_v27  ;;  %v2363_v27 = vld [vmem:[#allocation2 + $0x91] sm:$0xff] }
 0x301   : > { %4157 = vmatpush3.bf16.msra.mxu1 %v4154_v52  ;;  %3780 = vmatprep.mubr.f32.mxu1 %v5786_v34 }
 0x302   : > { %4159 = vmatprep.subr.bf16.mxu1 %v4158_v56 }
 0x305   : > { %4161 = vmatpush3.bf16.msra.mxu1 %v4158_v56 }
 0x306   : > { %4163 = vmatprep.subr.bf16.mxu1 %v4162_v59 }
 0x309   : > { %4165 = vmatpush3.bf16.msra.mxu1 %v4162_v59 }
 0x30c   : > { %3781 = vmatmul.mubr.f32.vlgmr.msra.gmra.mrb[0].mxu1 %v5789_v12 }
 0x30d   : > { %3783 = vmatprep.mubr.f32.mxu1 %v5792_v18 }
 0x310   : > { %3784 = vmatmul.mubr.f32.gmra.mrb[2].mxu1 %v5795_v46 }
 0x311   : > { %3786 = vmatprep.mubr.f32.mxu1 %v5798_v6 }
 0x314   : > { %3787 = vmatmul.mubr.f32.gmra.mrb[4].mxu1 %v5803_v4 }
 0x315   : > { %3789 = vmatprep.mubr.f32.mxu1 %v5810_v41 }
 0x318   : > { %3790 = vmatmul.mubr.f32.gmra.mrb[6].mxu1 %v5813_v13 }
 0x319   : > { %3792 = vmatprep.mubr.f32.mxu1 %v5816_v47 }
 0x31c   : > { %3793 = vmatmul.mubr.f32.gmra.mrb[8].mxu1 %v2361_v37 }
 0x31d   : > { %3795 = vmatprep.mubr.f32.mxu1 %v2362_v0 }
 0x320   : > { %3796 = vmatmul.mubr.f32.gmra.mrb[10].mxu1 %v2363_v27 }
 0x371   : > { %v3482_v34 = vpop.f32.mrb[24].mxu0 }
 0x372   : > { %v1451_v12 = vpop.f32.mrb[25].mxu0 }
 0x375   : > { %v3485_v18 = vpop.f32.mrb[26].mxu0 }
 0x376   : > { %v1461_v46 = vpop.f32.mrb[27].mxu0 }
 0x379   : > { %v3488_v61 = vpop.f32.mrb[28].mxu0 }
 0x37a   : > { %v1471_v6 = vpop.f32.mrb[29].mxu0 }
 0x37d   : > { %v3491_v60 = vpop.f32.mrb[30].mxu0 }
 0x37e   : > { %v1481_v4 = vpop.f32.mrb[31].mxu0 }
 0x381   : > { %v3494_v62 = vpop.f32.mrb[32].mxu0 }
 0x382   : > { %v1491_v41 = vpop.f32.mrb[33].mxu0 }
 0x385   : > { %v3497_v14 = vpop.f32.mrb[34].mxu0 }
 0x386   : > { %v5840_v13 = vpop.f32.mrb[35].mxu0 }
 0x3df   : > { %v3782_v47 = vpop.f32.mrb[0].mxu1 }
 0x3e0   : > { %v4166_v5 = vadd.f32 %v3782_v47, %v3482_v34  ;;  %v2447_v2 = vpop.f32.mrb[1].mxu1 }
 0x3e1   : > { %v4167_v50 = vadd.f32 %v2447_v2, %v1451_v12 }
 0x3e2   : > { %v5848_v36 = vadd.f32 %v4166_v5, %v5845_v43 }
 0x3e3   : > { %v5851_v49 = vadd.f32 %v4167_v50, %v5845_v43  ;;  %v3785_v21 = vpop.f32.mrb[2].mxu1 }
 0x3e4   : > { %v2538_v7 = vmin.f32 %v5848_v36, 20.0  ;;  %v4168_v1 = vadd.f32 %v3785_v21, %v3485_v18  ;;  %v2457_v30 = vpop.f32.mrb[3].mxu1 }
 0x3e5   : > { %v2537_v19 = vmin.f32 %v5851_v49, 20.0  ;;  %v4169_v40 = vadd.f32 %v2457_v30, %v1461_v46 }
 0x3e6   : > { %v2551_v54 = vmul.f32 1.442695, %v2538_v7  ;;  %v5856_v31 = vadd.f32 %v4168_v1, %v5845_v43 }
 0x3e7   : > { %v2549_v9 = vmul.f32 1.442695, %v2537_v19  ;;  %v5859_v63 = vadd.f32 %v4169_v40, %v5845_v43  ;;  %v3788_v20 = vpop.f32.mrb[4].mxu1 }
 0x3e8   : > { %4522 = vpow2.f32 %v2551_v54  ;;  %v2540_v55 = vmin.f32 %v5856_v31, 20.0  ;;  %v4170_v45 = vadd.f32 %v3788_v20, %v3488_v61  ;;  %v2467_v8 = vpop.f32.mrb[5].mxu1 }
 0x3e9   : > { %4524 = vpow2.f32 %v2549_v9  ;;  %v2539_v48 = vmin.f32 %v5859_v63, 20.0  ;;  %v4171_v3 = vadd.f32 %v2467_v8, %v1471_v6 }
 0x3ea   : > { %v2555_v22 = vmul.f32 1.442695, %v2540_v55  ;;  %v5864_v23 = vadd.f32 %v4170_v45, %v5845_v43 }
 0x3eb   : > { %v2553_v25 = vmul.f32 1.442695, %v2539_v48  ;;  %v5867_v26 = vadd.f32 %v4171_v3, %v5845_v43  ;;  %v3791_v28 = vpop.f32.mrb[6].mxu1 }
 0x3ec   : > { %4526 = vpow2.f32 %v2555_v22  ;;  %v2542_v16 = vmin.f32 %v5864_v23, 20.0  ;;  %v4172_v51 = vadd.f32 %v3791_v28, %v3491_v60  ;;  %v2477_v10 = vpop.f32.mrb[7].mxu1 }
 0x3ed   : > { %4528 = vpow2.f32 %v2553_v25  ;;  %v2541_v15 = vmin.f32 %v5867_v26, 20.0  ;;  %v4173_v44 = vadd.f32 %v2477_v10, %v1481_v4 }
 0x3ee   : > { %v2559_v39 = vmul.f32 1.442695, %v2542_v16  ;;  %v5872_v32 = vadd.f32 %v4172_v51, %v5845_v43 }
 0x3ef   : > { %v2557_v42 = vmul.f32 1.442695, %v2541_v15  ;;  %v5875_v35 = vadd.f32 %v4173_v44, %v5845_v43  ;;  %v3794_v29 = vpop.f32.mrb[8].mxu1 }
 0x3f0   : > { %4530 = vpow2.f32 %v2559_v39  ;;  %v2544_v38 = vmin.f32 %v5872_v32, 20.0  ;;  %v4174_v33 = vadd.f32 %v3794_v29, %v3494_v62  ;;  %v2487_v17 = vpop.f32.mrb[9].mxu1 }
 0x3f1   : > { %4532 = vpow2.f32 %v2557_v42  ;;  %v2543_v11 = vmin.f32 %v5875_v35, 20.0  ;;  %v4175_v52 = vadd.f32 %v2487_v17, %v1491_v41 }
 0x3f2   : > { %v4523_v53 = vpop.eup %4522  ;;  %v2563_v57 = vmul.f32 1.442695, %v2544_v38  ;;  %v5880_v56 = vadd.f32 %v4174_v33, %v5845_v43  ;;  %v2646_v38 = vld [vmem:[%s5380_s15 + $0x8] sm:$0xff] }
 0x3f3   : > { %v4525_v24 = vpop.eup %4524  ;;  %v2574_v58 = vadd.f32 2.0, %v4523_v53  ;;  %v2561_v59 = vmul.f32 1.442695, %v2543_v11  ;;  %v5883_v37 = vadd.f32 %v4175_v52, %v5845_v43  ;;  %v3797_v0 = vpop.f32.mrb[10].mxu1 }
 0x3f4   : > { %v2573_v27 = vadd.f32 2.0, %v4525_v24  ;;  %4534 = vpow2.f32 %v2563_v57  ;;  %v2546_v34 = vmin.f32 %v5880_v56, 20.0  ;;  %v4176_v12 = vadd.f32 %v3797_v0, %v3497_v14  ;;  %v2497_v18 = vpop.f32.mrb[11].mxu1  ;;  %v2645_v57 = vld [vmem:[%s5380_s15] sm:$0xff] }
 0x3f5   : > { %v2586_v46 = vmul.f32 %v4523_v53, %v2574_v58  ;;  %4536 = vpow2.f32 %v2561_v59  ;;  %v2545_v61 = vmin.f32 %v5883_v37, 20.0  ;;  %v4177_v6 = vadd.f32 %v2497_v18, %v5840_v13  ;;  %v2648_v18 = vld [vmem:[%s5380_s15 + $0x18] sm:$0xff] }
 0x3f6   : > { %v4527_v60 = vpop.eup %4526  ;;  %v2585_v4 = vmul.f32 %v4525_v24, %v2573_v27  ;;  %v2567_v62 = vmul.f32 1.442695, %v2546_v34  ;;  %v5889_v41 = vadd.f32 %v4176_v12, %v5845_v43 }
 0x3f7   : > { %v4529_v47 = vpop.eup %4528  ;;  %v2610_v5 = vadd.f32 2.0, %v2586_v46  ;;  %v2576_v2 = vadd.f32 2.0, %v4527_v60  ;;  %v2565_v50 = vmul.f32 1.442695, %v2545_v61  ;;  %v5893_v30 = vadd.f32 %v4177_v6, %v5845_v43 }
 0x3f8   : > { %v2609_v21 = vadd.f32 2.0, %v2585_v4  ;;  %v2575_v7 = vadd.f32 2.0, %v4529_v47  ;;  %4538 = vpow2.f32 %v2567_v62  ;;  %v2548_v1 = vmin.f32 %v5889_v41, 20.0 }
 0x3f9   : > { %4540 = vrcp.f32 %v2610_v5  ;;  %v2588_v14 = vmul.f32 %v4527_v60, %v2576_v2  ;;  %v2547_v48 = vmin.f32 %v5893_v30, 20.0  ;;  %v2598_v39 = vmul.f32 %v2586_v46, %v5848_v36 }
 0x3fa   : > { %v4531_v13 = vpop.eup %4530  ;;  %4542 = vrcp.f32 %v2609_v21  ;;  %v2587_v19 = vmul.f32 %v4529_v47, %v2575_v7  ;;  %v2571_v45 = vmul.f32 1.442695, %v2548_v1  ;;  %v2597_v33 = vmul.f32 %v2585_v4, %v5851_v49  ;;  %v2647_v4 = vld [vmem:[%s5380_s15 + $0x10] sm:$0xff] }
 0x3fb   : > { %v4533_v40 = vpop.eup %4532  ;;  %v2612_v54 = vadd.f32 2.0, %v2588_v14  ;;  %v2578_v9 = vadd.f32 2.0, %v4531_v13  ;;  %4544 = vpow2.f32 %v2565_v50  ;;  %v2569_v10 = vmul.f32 1.442695, %v2547_v48 }
 0x3fc   : > { %v2611_v20 = vadd.f32 2.0, %v2587_v19  ;;  %v2577_v55 = vadd.f32 2.0, %v4533_v40  ;;  %v2600_v27 = vmul.f32 %v2588_v14, %v5856_v31  ;;  %v2599_v46 = vmul.f32 %v2587_v19, %v5859_v63  ;;  %v2650_v14 = vld [vmem:[%s5380_s15 + $0x28] sm:$0xff] }
 0x3fd   : > { %4546 = vrcp.f32 %v2612_v54  ;;  %v2590_v8 = vmul.f32 %v4531_v13, %v2578_v9 }
 0x3fe   : > { %v4535_v3 = vpop.eup %4534  ;;  %4548 = vrcp.f32 %v2611_v20  ;;  %v2589_v22 = vmul.f32 %v4533_v40, %v2577_v55  ;;  %v2649_v40 = vld [vmem:[%s5380_s15 + $0x20] sm:$0xff] }
 0x3ff   : > { %v4537_v43 = vpop.eup %4536  ;;  %v2614_v25 = vadd.f32 2.0, %v2590_v8  ;;  %v2580_v28 = vadd.f32 2.0, %v4535_v3  ;;  %4550 = vpow2.f32 %v2571_v45  ;;  %v2602_v5 = vmul.f32 %v2590_v8, %v5864_v23 }
 0x400   : > { %v2613_v16 = vadd.f32 2.0, %v2589_v22  ;;  %v2579_v51 = vadd.f32 2.0, %v4537_v43  ;;  %v2601_v1 = vmul.f32 %v2589_v22, %v5867_v26 }
 0x401   : > { %4552 = vrcp.f32 %v2614_v25  ;;  %v2592_v15 = vmul.f32 %v4535_v3, %v2580_v28  ;;  %v2652_v3 = vld [vmem:[%s5380_s15 + $0x38] sm:$0xff]  ;;  %v2651_v28 = vld [vmem:[%s5380_s15 + $0x30] sm:$0xff] }
 0x402   : > { %v4539_v44 = vpop.eup %4538  ;;  %4554 = vrcp.f32 %v2613_v16  ;;  %v2591_v42 = vmul.f32 %v4537_v43, %v2579_v51 }
 0x403   : > { %v4541_v29 = vpop.eup %4540  ;;  %v2616_v17 = vadd.f32 2.0, %v2592_v15  ;;  %v2582_v11 = vadd.f32 2.0, %v4539_v44  ;;  %4556 = vpow2.f32 %v2569_v10  ;;  %v2604_v55 = vmul.f32 %v2592_v15, %v5872_v32 }
 0x404   : > { %v4543_v52 = vpop.eup %4542  ;;  %v2634_v53 = vmul.f32 %v4541_v29, %v2598_v39  ;;  %v2615_v24 = vadd.f32 2.0, %v2591_v42  ;;  %v2603_v22 = vmul.f32 %v2591_v42, %v5875_v35  ;;  %v2654_v35 = vld [vmem:[%s5380_s15 + $0x48] sm:$0xff] }
 0x405   : > { %v4545_v58 = vpop.eup %4544  ;;  %v2633_v59 = vmul.f32 %v4543_v52, %v2597_v33  ;;  %4558 = vrcp.f32 %v2616_v17  ;;  %v2594_v36 = vmul.f32 %v4539_v44, %v2582_v11  ;;  %v2653_v17 = vld [vmem:[%s5380_s15 + $0x40] sm:$0xff] }
 0x406   : > { %v2658_v0 = vadd.f32 %v2646_v38, %v2634_v53  ;;  %4560 = vrcp.f32 %v2615_v24  ;;  %v2581_v34 = vadd.f32 2.0, %v4545_v58 }
 0x407   : > { %v4547_v49 = vpop.eup %4546  ;;  %v2657_v12 = vadd.f32 %v2645_v57, %v2633_v59  ;;  %v2618_v61 = vadd.f32 2.0, %v2594_v36  ;;  %v2606_v10 = vmul.f32 %v2594_v36, %v5880_v56  ;;  %v2656_v57 = vld [vmem:[%s5380_s15 + $0x58] sm:$0xff]  ;;  %v2655_v36 = vld [vmem:[%s5380_s15 + $0x50] sm:$0xff]  ;;  %s4919_s15 = smov [#allocation14]  }
 0x408   : > { %v4549_v6 = vpop.eup %4548  ;;  %2670 = vst [vmem:[%s5905_s20 + $0x8] sm:$0xff] %v2658_v0  ;;  %v2636_v60 = vmul.f32 %v4547_v49, %v2600_v27  ;;  %v2593_v31 = vmul.f32 %v4545_v58, %v2581_v34  ;;  %s4748_s27 = sshll.u32 %s4919_s15, 4  ;;  %s4749_s27 = int_to_ptr.vmem [resolvable:$false] %s4748_s27 }
 0x409   : > { %v4551_v62 = vpop.eup %4550  ;;  %2669 = vst [vmem:[%s5905_s20] sm:$0xff] %v2657_v12  ;;  %v2635_v47 = vmul.f32 %v4549_v6, %v2599_v46  ;;  %4562 = vrcp.f32 %v2618_v61  ;;  %s4750_s2 = scalar_lea.vmem %s4749_s27, 3072  ;;  %p4751_p9 = scmp.lt.s32.totalorder %s5943_s25, %s4749_s27 }
 0x40a   : > { %v2660_v63 = vadd.f32 %v2648_v18, %v2636_v60  ;;  %v2617_v2 = vadd.f32 2.0, %v2593_v31  ;;  %v2584_v50 = vadd.f32 2.0, %v4551_v62  ;;  %v2605_v29 = vmul.f32 %v2593_v31, %v5883_v37  ;;  %p4752_p7 = scmp.lt.s32.totalorder %s4750_s2, %s4744_s30 }
 0x40b   : > { %v4553_v21 = vpop.eup %4552  ;;  %v2659_v7 = vadd.f32 %v2647_v4, %v2635_v47 }
 0x40c   : > { %v4555_v13 = vpop.eup %4554  ;;  %2672 = vst [vmem:[%s5905_s20 + $0x18] sm:$0xff] %v2660_v63  ;;  %v2638_v19 = vmul.f32 %v4553_v21, %v2602_v5  ;;  %4564 = vrcp.f32 %v2617_v2  ;;  %v2596_v54 = vmul.f32 %v4551_v62, %v2584_v50  ;;  %p4753_p6 = por %p4752_p7, %p4751_p9 }
 0x40d   : > { %v4557_v9 = vpop.eup %4556  ;;  %2671 = vst [vmem:[%s5905_s20 + $0x10] sm:$0xff] %v2659_v7  ;;  %v2637_v23 = vmul.f32 %v4555_v13, %v2601_v1 }
 0x40e   : > { %v2662_v20 = vadd.f32 %v2650_v14, %v2638_v19  ;;  %v2620_v45 = vadd.f32 2.0, %v2596_v54  ;;  %v2583_v8 = vadd.f32 2.0, %v4557_v9  ;;  %v2608_v52 = vmul.f32 %v2596_v54, %v5889_v41  ;;  %p4754_p12 = pnand %p4753_p6, %p4747_p2 }
 0x40f   : > { %v4559_v48 = vpop.eup %4558  ;;  %v2661_v26 = vadd.f32 %v2649_v40, %v2637_v23 }
 0x410   : > { %v4561_v43 = vpop.eup %4560  ;;  %2674 = vst [vmem:[%s5905_s20 + $0x28] sm:$0xff] %v2662_v20  ;;  %v2640_v25 = vmul.f32 %v4559_v48, %v2604_v55  ;;  %4566 = vrcp.f32 %v2620_v45  ;;  %v2595_v16 = vmul.f32 %v4557_v9, %v2583_v8 }
 0x411   : > { %2673 = vst [vmem:[%s5905_s20 + $0x20] sm:$0xff] %v2661_v26  ;;  %v2639_v32 = vmul.f32 %v4561_v43, %v2603_v22 }
 0x412   : > { %v2664_v51 = vadd.f32 %v2652_v3, %v2640_v25  ;;  %v2619_v15 = vadd.f32 2.0, %v2595_v16  ;;  %v2607_v58 = vmul.f32 %v2595_v16, %v5893_v30 }
 0x413   : > { %v4563_v44 = vpop.eup %4562  ;;  %v2663_v39 = vadd.f32 %v2651_v28, %v2639_v32 }
 0x414   : > { %2676 = vst [vmem:[%s5905_s20 + $0x38] sm:$0xff] %v2664_v51  ;;  %v2642_v42 = vmul.f32 %v4563_v44, %v2606_v10  ;;  %4568 = vrcp.f32 %v2619_v15 }
 0x415   : > { %2675 = vst [vmem:[%s5905_s20 + $0x30] sm:$0xff] %v2663_v39 }
 0x416   : > { %v4565_v38 = vpop.eup %4564  ;;  %v2666_v33 = vadd.f32 %v2654_v35, %v2642_v42 }
 0x417   : > { %v2641_v56 = vmul.f32 %v4565_v38, %v2605_v29 }
 0x418   : > { %2678 = vst [vmem:[%s5905_s20 + $0x48] sm:$0xff] %v2666_v33 }
 0x419   : > { %v2665_v11 = vadd.f32 %v2653_v17, %v2641_v56 }
 0x41a   : > { %v4567_v53 = vpop.eup %4566 }
 0x41b   : > { %2677 = vst [vmem:[%s5905_s20 + $0x40] sm:$0xff] %v2665_v11  ;;  %v2644_v37 = vmul.f32 %v4567_v53, %v2608_v52 }
 0x41d   : > { %v2668_v24 = vadd.f32 %v2656_v57, %v2644_v37 }
 0x41e   : > { %v4569_v59 = vpop.eup %4568 }
 0x41f   : > { %2680 = vst [vmem:[%s5905_s20 + $0x58] sm:$0xff] %v2668_v24  ;;  %v2643_v0 = vmul.f32 %v4569_v59, %v2607_v58 }
 0x421   : > { %v2667_v41 = vadd.f32 %v2655_v36, %v2643_v0 }
 0x423   : > { %2679 = vst [vmem:[%s5905_s20 + $0x50] sm:$0xff] %v2667_v41 }
 0x424   : > { %4757 = shalt.err (!%p4754_p12)
}
 0x425   : > { %s4758_s28 = scalar_lea.hbm %s5941_s10, 1536  ;;  %s4762_s20 = scalar_lea.hbm %s6133_s5, 12288 }
 0x426   : > { %p4759_p11 = scmp.ne.s32.totalorder %s5941_s10, %s4758_s28  ;;  %p4763_p13 = scmp.lt.u32.totalorder %s5941_s10, %s6133_s5 }
 0x427   : > { %p4764_p1 = scmp.lt.u32.totalorder %s4762_s20, %s4758_s28  ;;  %p4766_p5 = scmp.lt.u32.totalorder %s4758_s28, %s5941_s10 }
 0x428   : > { %p4760_p0 = pnand %p4759_p11, %p6134_p10 }
 0x429   : > { %p4765_p4 = por %p4764_p1, %p4763_p13 }
 0x42a   : > { %p4761_p3 = pneg %p4760_p0 }
 0x42b   : > { %p4767_p8 = por %p4766_p5, %p4765_p4 }
 0x42d   : > { %p4768_p2 = pnand %p4767_p8, %p4761_p3 }
 0x42f   : > { %4771 = shalt.err (!%p4768_p2)
}
 0x430   : > { %s4920_s9 = smov 128   ;;  %s4921_s4 = smov 8  }
 0x431   : > { %4294 = dma.vmem_to_hbm [thread:$0]  (%p6134_p10), %s5943_s25, 1536, %s5941_s10, %s2682_s6, %s4920_s9, %s4920_s9, %s4921_s4  }
 0x432 PF: > { %p4327_p9 = scmp.ge.s32.totalorder %s4906_s18, 2  ;;  %s2713_s22 = sand.u32 1, %s4878_s11  }
 0x433   : > { %p6135_p7 = scmp.ne.s32.totalorder %s6102_s8, 0  ;;  %s2714_s19 = scalar_lea.sflag [#allocation5], %s2713_s22 }
 0x435   : > { %p4317_p6 = pnand %p4327_p9, %p6135_p7 }
 0x437   : > { %4849 = dma.done.wait (!%p4317_p6), %s2714_s19, 1536  }
 0x438   : > { %4851 = vsyncadd (!%p4317_p6), %s2714_s19, 4294965760  ;;  %s29_s18 = sadd.s32 1, %s4906_s18   ;;  %s6137_s27 = sld [smem:[#allocation22_spill]] }
 0x439   : > { %p5975_p12 = scmp.ge.s32.totalorder %s29_s18, 10   ;;  %s6138_s30 = sld [smem:[#allocation23_spill]] }
 0x43a   : > { %s6139_s9 = sld [smem:[#allocation24_spill]]  ;;  %s6140_s10 = sld [smem:[#allocation34_spill]] }
 0x43b   : > { %s6141_s15 = sld [smem:[#allocation27_spill]]  ;;  %s6142_s26 = sld [smem:[#allocation29_spill]] }
 0x43c   : > { %s6143_s17 = sld [smem:[#allocation30_spill]]  ;;  %s6144_s28 = smov %s4862_s29 }
 0x43d   : > { %s6145_s29 = smov %s5332_s21  ;;  %s6146_s11 = smov %s4882_s12 }
 0x43e   : > { %s6147_s12 = smov %s4886_s13  ;;  %s6148_s13 = smov %s5233_s7 }
 0x43f   : > { %s6149_s14 = smov %s4898_s16  ;;  %28 = sbr.rel (!%p5975_p12) target bundleno = 24 (0x18), region = 141 }
 0x441   : > { %s6150_s16 = smov %s6142_s26 }
 0x446   :  { %2719 = vsyncpa [#allocation4], 1 }
 0x447   :  { %2721 = vsyncpa [#allocation4 + $0x1], 1 }
 0x448   :  { %2722 = vsyncpa [#allocation7], 1 }
 0x449   :  { %2724 = vsyncpa [#allocation7 + $0x1], 1 }
 0x44a   :  { %2725 = vsyncpa [#allocation10], 1 }
 0x44b   :  { %2726 = vsyncpa [#allocation13], 1 }
 0x44c   :  { %2727 = vsyncpa [#allocation5], 1 }
 0x44d   :  { %2729 = vsyncpa [#allocation5 + $0x1], 1 }

</bundles_post_ra>
